<compile_context>
chip_gen: v6e
topology: v6e:2x2x1
jax: 0.10.0
libtpu: 0.0.40
codegen_flags: <defaults>
</compile_context>

<pallas_src>
import jax
import jax.numpy as jnp
from jax.experimental import pallas as pl
from jax.experimental.pallas import tpu as pltpu

LANE = 128
SUBLANE = 8
LRELU_SLOPE = 0.2
OUT_CHANNELS = 100
# (kernel_h, stride_h, pad_h) of the four H-axis convs (layers 2..5).
H_CONVS = ((4, 2, 1), (8, 1, 1), (4, 2, 1), (5, 1, 0))


def _round_up(v, m):
    return (v + m - 1) // m * m


# ----------------------------------------------------------------------------
# Static geometry ("plan") for the fused kernel
# ----------------------------------------------------------------------------
def make_plan(batch, height, in_dim, hidden_num, b_tile=8):
    assert b_tile % SUBLANE == 0, "b_tile is the sublane dim -> multiple of 8"
    chans = [hidden_num, hidden_num * 2, hidden_num * 4, hidden_num * 8, OUT_CHANNELS]
    cpad = [_round_up(c, LANE) for c in chans]

    geoms = []
    h_in = height
    for kh, stride, pad in H_CONVS:
        h_out = (h_in + 2 * pad - kh) // stride + 1
        assert h_out >= 1, "input height too small for the Encoder geometry"
        geoms.append(dict(kh=kh, stride=stride, pad=pad, h_in=h_in, h_out=h_out))
        h_in = h_out

    # Scratch j holds the conv-padded input of H-conv j: (h_in + 2*pad, B_TILE, cpad[j]).
    buf_rows = [g["h_in"] + 2 * g["pad"] for g in geoms]
    batch_pad = _round_up(max(batch, b_tile), b_tile)
    return dict(batch=batch, batch_pad=batch_pad, grid=batch_pad // b_tile,
                b_tile=b_tile, height=height, in_dim=in_dim, chans=chans, cpad=cpad,
                geoms=geoms, buf_rows=buf_rows, h_final=geoms[-1]["h_out"])


# ----------------------------------------------------------------------------
# Parameters (PyTorch layout) + one-time packing for the kernel
# ----------------------------------------------------------------------------
def init_encoder_weights(key, in_dim, hidden_num):
    """PyTorch-layout conv weights (OC, IC, KH, KW); bias=False everywhere."""
    shapes = [
        (hidden_num, 1, 1, in_dim),
        (hidden_num * 2, hidden_num, 4, 1),
        (hidden_num * 4, hidden_num * 2, 8, 1),
        (hidden_num * 8, hidden_num * 4, 4, 1),
        (OUT_CHANNELS, hidden_num * 8, 5, 1),
    ]
    keys = jax.random.split(key, len(shapes))
    ws = []
    for k, s in zip(keys, shapes):
        fan_in = s[1] * s[2] * s[3]
        bound = 1.0 / (fan_in ** 0.5)
        ws.append(jax.random.uniform(k, s, jnp.float32, -bound, bound))
    return ws


def _pack_width_conv(w, c_out_pad):
    # (OC, 1, 1, in_dim) -> (in_dim, c_out_pad) bf16 (no lane padding of K needed).
    oc, _, _, in_dim = w.shape
    full = jnp.zeros((in_dim, c_out_pad), jnp.float32)
    full = full.at[:, :oc].set(w[:, 0, 0, :].T)
    return full.astype(jnp.bfloat16)


def _pack_height_conv(w, c_in_pad, c_out_pad):
    # (OC, IC, KH, 1) -> (KH * c_in_pad, c_out_pad) bf16; tap i occupies rows
    # [i*c_in_pad, (i+1)*c_in_pad).  Padded rows/cols are zero, so padded activation
    # lanes can never leak into valid outputs.
    oc, ic, kh, kw = w.shape
    assert kw == 1
    taps = jnp.transpose(w[:, :, :, 0], (2, 1, 0))          # (KH, IC, OC)
    full = jnp.zeros((kh, c_in_pad, c_out_pad), jnp.float32)
    full = full.at[:, :ic, :oc].set(taps)
    return full.reshape(kh * c_in_pad, c_out_pad).astype(jnp.bfloat16)


def pack_encoder_weights(ws, plan):
    """One-time prep: transpose / zero-pad to 128-lane multiples / cast to bf16."""
    cp = plan["cpad"]
    return [
        _pack_width_conv(ws[0], cp[0]),
        _pack_height_conv(ws[1], cp[0], cp[1]),
        _pack_height_conv(ws[2], cp[1], cp[2]),
        _pack_height_conv(ws[3], cp[2], cp[3]),
        _pack_height_conv(ws[4], cp[3], cp[4]),
    ]


# ----------------------------------------------------------------------------
# The fused kernel (one grid step == B_TILE samples; batch on the sublane axis)
# ----------------------------------------------------------------------------
def _build_kernel(plan):
    geoms = plan["geoms"]
    cp = plan["cpad"]
    height = plan["height"]
    B = plan["b_tile"]

    def lrelu(v):
        return jnp.maximum(v, LRELU_SLOPE * v)               # LeakyReLU(0.2), one VPU op

    def kernel(x_ref, w1_ref, w2_ref, w3_ref, w4_ref, w5_ref, o_ref,
               a0_ref, a1_ref, a2_ref, a3_ref):
        a_refs = (a0_ref, a1_ref, a2_ref, a3_ref)
        w_refs = (w2_ref, w3_ref, w4_ref, w5_ref)

        # Zero ONLY the conv padding rows of each activation scratch (valid rows are
        # fully overwritten every step; padded channel lanes are killed by zero weights).
        for j, g in enumerate(geoms):
            if g["pad"]:
                z = jnp.zeros((g["pad"], B, cp[j]), jnp.float32)
                a_refs[j][pl.ds(0, g["pad"]), :, :] = z
                a_refs[j][pl.ds(g["pad"] + g["h_in"], g["pad"]), :, :] = z

        # Layer 1: Conv(1 -> h, kernel (1, in_dim)) == one matmul over W for all
        # (sample, row) pairs of the tile.  Rows are ordered (height-major, sample-minor).
        x2 = x_ref[...].astype(jnp.bfloat16)                  # (height*B, in_dim)
        h0 = jnp.dot(x2, w1_ref[...], preferred_element_type=jnp.float32)
        a_refs[0][pl.ds(geoms[0]["pad"], height), :, :] = \
            lrelu(h0).reshape(height, B, cp[0])

        # Layers 2..5: 1-D convs over H.  All kh taps fused into ONE MXU matmul per layer
        # via lane-axis im2col; stride-2 handled by even/odd row phases (contiguous
        # slices only, no strided loads).
        for j, g in enumerate(geoms):
            src, w_ref = a_refs[j], w_refs[j]
            kh, s, h_out = g["kh"], g["stride"], g["h_out"]
            win = src[...]                                    # (rows, B, c_in_pad) f32, one load

            if s == 1:
                phases = [win]
            else:
                max_row = (h_out - 1) * s + kh - 1            # last padded-input row touched
                phases = []
                for p in range(s):
                    n_p = (max_row - p) // s + 1
                    phases.append(jnp.concatenate(
                        [win[p + s * r: p + s * r + 1] for r in range(n_p)], axis=0))

            taps = [phases[i % s][i // s: i // s + h_out] for i in range(kh)]
            lhs = jnp.concatenate(taps, axis=-1)              # (h_out, B, kh*c_in_pad)
            lhs = lhs.reshape(h_out * B, kh * cp[j]).astype(jnp.bfloat16)   # one cast/layer
            acc = jnp.dot(lhs, w_ref[...], preferred_element_type=jnp.float32)

            if j + 1 < len(geoms):
                dst, nxt = a_refs[j + 1], geoms[j + 1]
                dst[pl.ds(nxt["pad"], h_out), :, :] = lrelu(acc).reshape(h_out, B, cp[j + 1])
            else:
                # Final conv: no activation; single full unmasked (h_out*B, 128) store.
                o_ref[...] = acc

    return kernel


# ----------------------------------------------------------------------------
# Host wrapper: one pallas_call for the whole forward pass
# ----------------------------------------------------------------------------
def make_encoder_forward(plan):
    kernel = _build_kernel(plan)
    B, G = plan["b_tile"], plan["grid"]
    height, in_dim = plan["height"], plan["in_dim"]
    cp, geoms = plan["cpad"], plan["geoms"]
    h_final = plan["h_final"]
    batch, batch_pad = plan["batch"], plan["batch_pad"]

    w_specs = [pl.BlockSpec((in_dim, cp[0]), lambda n: (0, 0))]
    for j, g in enumerate(geoms):
        w_specs.append(pl.BlockSpec((g["kh"] * cp[j], cp[j + 1]), lambda n: (0, 0)))

    grid_spec = pltpu.PrefetchScalarGridSpec(
        num_scalar_prefetch=0,
        grid=(G,),                                            # B_TILE samples per step
        in_specs=[pl.BlockSpec((height * B, in_dim), lambda n: (n, 0))] + w_specs,
        out_specs=pl.BlockSpec((h_final * B, cp[-1]), lambda n: (n, 0)),
        scratch_shapes=[pltpu.VMEM((plan["buf_rows"][j], B, cp[j]), jnp.float32)
                        for j in range(len(geoms))],
    )
    call = pl.pallas_call(
        kernel,
        out_shape=jax.ShapeDtypeStruct((G * h_final * B, cp[-1]), jnp.float32),
        grid_spec=grid_spec,
        compiler_params=pltpu.CompilerParams(
            dimension_semantics=("parallel",)),               # v7x: 2 TCs split the grid
    )

    def forward(packed_ws, x):
        # x: (N, 1, H, in_dim) float32, NCHW as in PyTorch.
        assert x.shape == (batch, 1, height, in_dim), x.shape
        xs = x[:, 0].astype(jnp.float32)                      # (N, H, D), no lane padding
        if batch_pad > batch:
            xs = jnp.pad(xs, ((0, batch_pad - batch), (0, 0), (0, 0)))
        # Row order inside each block: (height-major, sample-minor) -> batch on sublanes.
        xr = xs.reshape(G, B, height, in_dim).transpose(0, 2, 1, 3)
        xr = xr.reshape(G * height * B, in_dim)
        out = call(xr, *packed_ws)                            # (G*h_final*B, cp[-1]) f32
        out = out.reshape(G, h_final, B, cp[-1])[:, :, :, :OUT_CHANNELS]
        out = out.transpose(0, 2, 3, 1).reshape(batch_pad, OUT_CHANNELS, h_final)
        return out[:batch, :, :, None]                        # (N, 100, H_out, 1) NCHW

    return jax.jit(forward)


# ----------------------------------------------------------------------------
# Pure-JAX reference (lax.conv) mimicking the kernel numerics (bf16 in, f32 acc)
# ----------------------------------------------------------------------------
def encoder_reference(ws, x):
    specs = [((1, 1), ((0, 0), (0, 0))),
             ((2, 1), ((1, 1), (0, 0))),
             ((1, 1), ((1, 1), (0, 0))),
             ((2, 1), ((1, 1), (0, 0))),
             ((1, 1), ((0, 0), (0, 0)))]
    a = x.astype(jnp.bfloat16)
    for li, (w, (strides, pad)) in enumerate(zip(ws, specs)):
        y = jax.lax.conv_general_dilated(
            a, w.astype(jnp.bfloat16),
            window_strides=strides, padding=pad,
            dimension_numbers=("NCHW", "OIHW", "NCHW"),
            preferred_element_type=jnp.float32)
        if li < len(ws) - 1:
            y = jnp.maximum(y, LRELU_SLOPE * y)
            a = y.astype(jnp.bfloat16)
        else:
            a = y
    return a


if __name__ == "__main__":
    key = jax.random.PRNGKey(0)
    k_x, k_w = jax.random.split(key)

    # H=32 keeps every intermediate height positive (final height 1).  batch=16 with
    # B_TILE=8 gives grid=(2,): even and >=2, so both v7x TensorCores get work.
    BATCH, HEIGHT, IN_DIM, HIDDEN = 16, 32, 16, 32

    x = jax.random.normal(k_x, (BATCH, 1, HEIGHT, IN_DIM), jnp.float32)
    ws = init_encoder_weights(k_w, IN_DIM, HIDDEN)

    plan = make_plan(BATCH, HEIGHT, IN_DIM, HIDDEN, b_tile=8)
    packed = pack_encoder_weights(ws, plan)
    forward = make_encoder_forward(plan)

    out = jax.block_until_ready(forward(packed, x))
    assert out.shape == (BATCH, OUT_CHANNELS, 1, 1), out.shape

    ref = jax.block_until_ready(encoder_reference(ws, x))
    max_err = float(jnp.max(jnp.abs(out - ref)))
    assert jnp.allclose(out, ref, atol=5e-3, rtol=2e-2), f"max abs err {max_err}"

    print("KERNEL_OK")
</pallas_src>

<mosaic_0001>
module attributes {stable_mosaic.version = 11 : i64} {
  func.func @kernel(%arg0: i32, %arg1: memref<256x16xf32, #tpu.memory_space<vmem>>, %arg2: memref<16x128xbf16, #tpu.memory_space<vmem>>, %arg3: memref<512x128xbf16, #tpu.memory_space<vmem>>, %arg4: memref<1024x128xbf16, #tpu.memory_space<vmem>>, %arg5: memref<512x256xbf16, #tpu.memory_space<vmem>>, %arg6: memref<1280x128xbf16, #tpu.memory_space<vmem>>, %arg7: memref<8x128xf32, #tpu.memory_space<vmem>>, %arg8: memref<34x8x128xf32, #tpu.memory_space<vmem>>, %arg9: memref<18x8x128xf32, #tpu.memory_space<vmem>>, %arg10: memref<13x8x128xf32, #tpu.memory_space<vmem>>, %arg11: memref<5x8x256xf32, #tpu.memory_space<vmem>>) attributes {dimension_semantics = [#tpu.dimension_semantics<parallel>], iteration_bounds = array<i64: 2>, scalar_prefetch = 0 : i64, scratch_operands = 4 : i64, tpu.core_type = #tpu.core_type<tc>, window_params = [{transform_indices = @transform_0, window_bounds = array<i64: 256, 16>}, {pipeline_mode = #tpu.pipeline_mode<synchronous>, transform_indices = @transform_1, window_bounds = array<i64: 16, 128>}, {pipeline_mode = #tpu.pipeline_mode<synchronous>, transform_indices = @transform_2, window_bounds = array<i64: 512, 128>}, {pipeline_mode = #tpu.pipeline_mode<synchronous>, transform_indices = @transform_3, window_bounds = array<i64: 1024, 128>}, {pipeline_mode = #tpu.pipeline_mode<synchronous>, transform_indices = @transform_4, window_bounds = array<i64: 512, 256>}, {pipeline_mode = #tpu.pipeline_mode<synchronous>, transform_indices = @transform_5, window_bounds = array<i64: 1280, 128>}, {transform_indices = @transform_6, window_bounds = array<i64: 8, 128>}]} {
    %cst = arith.constant 0.000000e+00 : f32
    %0 = vector.broadcast %cst : f32 to vector<1x8x128xf32>
    %c0 = arith.constant 0 : index
    %c0_0 = arith.constant 0 : index
    %c0_1 = arith.constant 0 : index
    %1 = vector.load %arg8[%c0, %c0_0, %c0_1] : memref<34x8x128xf32, #tpu.memory_space<vmem>>, vector<1x8x128xf32>
    tpu.vector_store %arg8[%c0, %c0_0, %c0_1], %0 {strides = array<i32>} : memref<34x8x128xf32, #tpu.memory_space<vmem>>, vector<1x8x128xf32>,
    %c33 = arith.constant 33 : index
    %c0_2 = arith.constant 0 : index
    %c0_3 = arith.constant 0 : index
    %2 = vector.load %arg8[%c33, %c0_2, %c0_3] : memref<34x8x128xf32, #tpu.memory_space<vmem>>, vector<1x8x128xf32>
    tpu.vector_store %arg8[%c33, %c0_2, %c0_3], %0 {strides = array<i32>} : memref<34x8x128xf32, #tpu.memory_space<vmem>>, vector<1x8x128xf32>,
    %cst_4 = arith.constant 0.000000e+00 : f32
    %3 = vector.broadcast %cst_4 : f32 to vector<1x8x128xf32>
    %c0_5 = arith.constant 0 : index
    %c0_6 = arith.constant 0 : index
    %c0_7 = arith.constant 0 : index
    %4 = vector.load %arg9[%c0_5, %c0_6, %c0_7] : memref<18x8x128xf32, #tpu.memory_space<vmem>>, vector<1x8x128xf32>
    tpu.vector_store %arg9[%c0_5, %c0_6, %c0_7], %3 {strides = array<i32>} : memref<18x8x128xf32, #tpu.memory_space<vmem>>, vector<1x8x128xf32>,
    %c17 = arith.constant 17 : index
    %c0_8 = arith.constant 0 : index
    %c0_9 = arith.constant 0 : index
    %5 = vector.load %arg9[%c17, %c0_8, %c0_9] : memref<18x8x128xf32, #tpu.memory_space<vmem>>, vector<1x8x128xf32>
    tpu.vector_store %arg9[%c17, %c0_8, %c0_9], %3 {strides = array<i32>} : memref<18x8x128xf32, #tpu.memory_space<vmem>>, vector<1x8x128xf32>,
    %cst_10 = arith.constant 0.000000e+00 : f32
    %6 = vector.broadcast %cst_10 : f32 to vector<1x8x128xf32>
    %c0_11 = arith.constant 0 : index
    %c0_12 = arith.constant 0 : index
    %c0_13 = arith.constant 0 : index
    %7 = vector.load %arg10[%c0_11, %c0_12, %c0_13] : memref<13x8x128xf32, #tpu.memory_space<vmem>>, vector<1x8x128xf32>
    tpu.vector_store %arg10[%c0_11, %c0_12, %c0_13], %6 {strides = array<i32>} : memref<13x8x128xf32, #tpu.memory_space<vmem>>, vector<1x8x128xf32>,
    %c12 = arith.constant 12 : index
    %c0_14 = arith.constant 0 : index
    %c0_15 = arith.constant 0 : index
    %8 = vector.load %arg10[%c12, %c0_14, %c0_15] : memref<13x8x128xf32, #tpu.memory_space<vmem>>, vector<1x8x128xf32>
    tpu.vector_store %arg10[%c12, %c0_14, %c0_15], %6 {strides = array<i32>} : memref<13x8x128xf32, #tpu.memory_space<vmem>>, vector<1x8x128xf32>,
    %c0_16 = arith.constant 0 : index
    %c0_17 = arith.constant 0 : index
    %9 = vector.load %arg1[%c0_16, %c0_17] : memref<256x16xf32, #tpu.memory_space<vmem>>, vector<256x16xf32>
    %10 = arith.truncf %9 : vector<256x16xf32> to vector<256x16xbf16>
    %c0_18 = arith.constant 0 : index
    %c0_19 = arith.constant 0 : index
    %11 = vector.load %arg2[%c0_18, %c0_19] : memref<16x128xbf16, #tpu.memory_space<vmem>>, vector<16x128xbf16>
    %cst_20 = arith.constant dense<0.000000e+00> : vector<256x128xf32>
    %12 = tpu.matmul %10, %11, %cst_20 {dimension_numbers = #tpu.dot_dimension_numbers<[1], [0], [0], [1], [0, 0, 1, 1], [], []>} : vector<256x16xbf16>, vector<16x128xbf16>, vector<256x128xf32> -> vector<256x128xf32>
    %cst_21 = arith.constant 2.000000e-01 : f32
    %13 = vector.broadcast %cst_21 : f32 to vector<256x128xf32>
    %14 = arith.mulf %13, %12 : vector<256x128xf32>
    %15 = arith.maximumf %12, %14 : vector<256x128xf32>
    %16 = vector.shape_cast %15 : vector<256x128xf32> to vector<32x8x128xf32>
    %c1 = arith.constant 1 : index
    %c0_22 = arith.constant 0 : index
    %c0_23 = arith.constant 0 : index
    %17 = vector.load %arg8[%c1, %c0_22, %c0_23] : memref<34x8x128xf32, #tpu.memory_space<vmem>>, vector<32x8x128xf32>
    tpu.vector_store %arg8[%c1, %c0_22, %c0_23], %16 {strides = array<i32>} : memref<34x8x128xf32, #tpu.memory_space<vmem>>, vector<32x8x128xf32>,
    %c0_24 = arith.constant 0 : index
    %c0_25 = arith.constant 0 : index
    %c0_26 = arith.constant 0 : index
    %18 = vector.load %arg8[%c0_24, %c0_25, %c0_26] : memref<34x8x128xf32, #tpu.memory_space<vmem>>, vector<34x8x128xf32>
    %19 = vector.extract_strided_slice %18 {offsets = [0, 0, 0], sizes = [1, 8, 128], strides = [1, 1, 1]} : vector<34x8x128xf32> to vector<1x8x128xf32>
    %20 = vector.extract_strided_slice %18 {offsets = [2, 0, 0], sizes = [1, 8, 128], strides = [1, 1, 1]} : vector<34x8x128xf32> to vector<1x8x128xf32>
    %21 = vector.extract_strided_slice %18 {offsets = [4, 0, 0], sizes = [1, 8, 128], strides = [1, 1, 1]} : vector<34x8x128xf32> to vector<1x8x128xf32>
    %22 = vector.extract_strided_slice %18 {offsets = [6, 0, 0], sizes = [1, 8, 128], strides = [1, 1, 1]} : vector<34x8x128xf32> to vector<1x8x128xf32>
    %23 = vector.extract_strided_slice %18 {offsets = [8, 0, 0], sizes = [1, 8, 128], strides = [1, 1, 1]} : vector<34x8x128xf32> to vector<1x8x128xf32>
    %24 = vector.extract_strided_slice %18 {offsets = [10, 0, 0], sizes = [1, 8, 128], strides = [1, 1, 1]} : vector<34x8x128xf32> to vector<1x8x128xf32>
    %25 = vector.extract_strided_slice %18 {offsets = [12, 0, 0], sizes = [1, 8, 128], strides = [1, 1, 1]} : vector<34x8x128xf32> to vector<1x8x128xf32>
    %26 = vector.extract_strided_slice %18 {offsets = [14, 0, 0], sizes = [1, 8, 128], strides = [1, 1, 1]} : vector<34x8x128xf32> to vector<1x8x128xf32>
    %27 = vector.extract_strided_slice %18 {offsets = [16, 0, 0], sizes = [1, 8, 128], strides = [1, 1, 1]} : vector<34x8x128xf32> to vector<1x8x128xf32>
    %28 = vector.extract_strided_slice %18 {offsets = [18, 0, 0], sizes = [1, 8, 128], strides = [1, 1, 1]} : vector<34x8x128xf32> to vector<1x8x128xf32>
    %29 = vector.extract_strided_slice %18 {offsets = [20, 0, 0], sizes = [1, 8, 128], strides = [1, 1, 1]} : vector<34x8x128xf32> to vector<1x8x128xf32>
    %30 = vector.extract_strided_slice %18 {offsets = [22, 0, 0], sizes = [1, 8, 128], strides = [1, 1, 1]} : vector<34x8x128xf32> to vector<1x8x128xf32>
    %31 = vector.extract_strided_slice %18 {offsets = [24, 0, 0], sizes = [1, 8, 128], strides = [1, 1, 1]} : vector<34x8x128xf32> to vector<1x8x128xf32>
    %32 = vector.extract_strided_slice %18 {offsets = [26, 0, 0], sizes = [1, 8, 128], strides = [1, 1, 1]} : vector<34x8x128xf32> to vector<1x8x128xf32>
    %33 = vector.extract_strided_slice %18 {offsets = [28, 0, 0], sizes = [1, 8, 128], strides = [1, 1, 1]} : vector<34x8x128xf32> to vector<1x8x128xf32>
    %34 = vector.extract_strided_slice %18 {offsets = [30, 0, 0], sizes = [1, 8, 128], strides = [1, 1, 1]} : vector<34x8x128xf32> to vector<1x8x128xf32>
    %35 = vector.extract_strided_slice %18 {offsets = [32, 0, 0], sizes = [1, 8, 128], strides = [1, 1, 1]} : vector<34x8x128xf32> to vector<1x8x128xf32>
    %36 = tpu.concatenate %19, %20, %21, %22, %23, %24, %25, %26, %27, %28, %29, %30, %31, %32, %33, %34 in 0 : vector<1x8x128xf32>, vector<1x8x128xf32>, vector<1x8x128xf32>, vector<1x8x128xf32>, vector<1x8x128xf32>, vector<1x8x128xf32>, vector<1x8x128xf32>, vector<1x8x128xf32>, vector<1x8x128xf32>, vector<1x8x128xf32>, vector<1x8x128xf32>, vector<1x8x128xf32>, vector<1x8x128xf32>, vector<1x8x128xf32>, vector<1x8x128xf32>, vector<1x8x128xf32> -> vector<16x8x128xf32>
    %37 = tpu.concatenate %36, %35 in 0 : vector<16x8x128xf32>, vector<1x8x128xf32> -> vector<17x8x128xf32>
    %38 = vector.extract_strided_slice %18 {offsets = [1, 0, 0], sizes = [1, 8, 128], strides = [1, 1, 1]} : vector<34x8x128xf32> to vector<1x8x128xf32>
    %39 = vector.extract_strided_slice %18 {offsets = [3, 0, 0], sizes = [1, 8, 128], strides = [1, 1, 1]} : vector<34x8x128xf32> to vector<1x8x128xf32>
    %40 = vector.extract_strided_slice %18 {offsets = [5, 0, 0], sizes = [1, 8, 128], strides = [1, 1, 1]} : vector<34x8x128xf32> to vector<1x8x128xf32>
    %41 = vector.extract_strided_slice %18 {offsets = [7, 0, 0], sizes = [1, 8, 128], strides = [1, 1, 1]} : vector<34x8x128xf32> to vector<1x8x128xf32>
    %42 = vector.extract_strided_slice %18 {offsets = [9, 0, 0], sizes = [1, 8, 128], strides = [1, 1, 1]} : vector<34x8x128xf32> to vector<1x8x128xf32>
    %43 = vector.extract_strided_slice %18 {offsets = [11, 0, 0], sizes = [1, 8, 128], strides = [1, 1, 1]} : vector<34x8x128xf32> to vector<1x8x128xf32>
    %44 = vector.extract_strided_slice %18 {offsets = [13, 0, 0], sizes = [1, 8, 128], strides = [1, 1, 1]} : vector<34x8x128xf32> to vector<1x8x128xf32>
    %45 = vector.extract_strided_slice %18 {offsets = [15, 0, 0], sizes = [1, 8, 128], strides = [1, 1, 1]} : vector<34x8x128xf32> to vector<1x8x128xf32>
    %46 = vector.extract_strided_slice %18 {offsets = [17, 0, 0], sizes = [1, 8, 128], strides = [1, 1, 1]} : vector<34x8x128xf32> to vector<1x8x128xf32>
    %47 = vector.extract_strided_slice %18 {offsets = [19, 0, 0], sizes = [1, 8, 128], strides = [1, 1, 1]} : vector<34x8x128xf32> to vector<1x8x128xf32>
    %48 = vector.extract_strided_slice %18 {offsets = [21, 0, 0], sizes = [1, 8, 128], strides = [1, 1, 1]} : vector<34x8x128xf32> to vector<1x8x128xf32>
    %49 = vector.extract_strided_slice %18 {offsets = [23, 0, 0], sizes = [1, 8, 128], strides = [1, 1, 1]} : vector<34x8x128xf32> to vector<1x8x128xf32>
    %50 = vector.extract_strided_slice %18 {offsets = [25, 0, 0], sizes = [1, 8, 128], strides = [1, 1, 1]} : vector<34x8x128xf32> to vector<1x8x128xf32>
    %51 = vector.extract_strided_slice %18 {offsets = [27, 0, 0], sizes = [1, 8, 128], strides = [1, 1, 1]} : vector<34x8x128xf32> to vector<1x8x128xf32>
    %52 = vector.extract_strided_slice %18 {offsets = [29, 0, 0], sizes = [1, 8, 128], strides = [1, 1, 1]} : vector<34x8x128xf32> to vector<1x8x128xf32>
    %53 = vector.extract_strided_slice %18 {offsets = [31, 0, 0], sizes = [1, 8, 128], strides = [1, 1, 1]} : vector<34x8x128xf32> to vector<1x8x128xf32>
    %54 = vector.extract_strided_slice %18 {offsets = [33, 0, 0], sizes = [1, 8, 128], strides = [1, 1, 1]} : vector<34x8x128xf32> to vector<1x8x128xf32>
    %55 = tpu.concatenate %38, %39, %40, %41, %42, %43, %44, %45, %46, %47, %48, %49, %50, %51, %52, %53 in 0 : vector<1x8x128xf32>, vector<1x8x128xf32>, vector<1x8x128xf32>, vector<1x8x128xf32>, vector<1x8x128xf32>, vector<1x8x128xf32>, vector<1x8x128xf32>, vector<1x8x128xf32>, vector<1x8x128xf32>, vector<1x8x128xf32>, vector<1x8x128xf32>, vector<1x8x128xf32>, vector<1x8x128xf32>, vector<1x8x128xf32>, vector<1x8x128xf32>, vector<1x8x128xf32> -> vector<16x8x128xf32>
    %56 = tpu.concatenate %55, %54 in 0 : vector<16x8x128xf32>, vector<1x8x128xf32> -> vector<17x8x128xf32>
    %57 = vector.extract_strided_slice %37 {offsets = [0, 0, 0], sizes = [16, 8, 128], strides = [1, 1, 1]} : vector<17x8x128xf32> to vector<16x8x128xf32>
    %58 = vector.extract_strided_slice %56 {offsets = [0, 0, 0], sizes = [16, 8, 128], strides = [1, 1, 1]} : vector<17x8x128xf32> to vector<16x8x128xf32>
    %59 = vector.extract_strided_slice %37 {offsets = [1, 0, 0], sizes = [16, 8, 128], strides = [1, 1, 1]} : vector<17x8x128xf32> to vector<16x8x128xf32>
    %60 = vector.extract_strided_slice %56 {offsets = [1, 0, 0], sizes = [16, 8, 128], strides = [1, 1, 1]} : vector<17x8x128xf32> to vector<16x8x128xf32>
    %61 = tpu.concatenate %57, %58, %59, %60 in 2 : vector<16x8x128xf32>, vector<16x8x128xf32>, vector<16x8x128xf32>, vector<16x8x128xf32> -> vector<16x8x512xf32>
    %62 = vector.shape_cast %61 : vector<16x8x512xf32> to vector<128x512xf32>
    %63 = arith.truncf %62 : vector<128x512xf32> to vector<128x512xbf16>
    %c0_27 = arith.constant 0 : index
    %c0_28 = arith.constant 0 : index
    %64 = vector.load %arg3[%c0_27, %c0_28] : memref<512x128xbf16, #tpu.memory_space<vmem>>, vector<512x128xbf16>
    %cst_29 = arith.constant dense<0.000000e+00> : vector<128x128xf32>
    %65 = tpu.matmul %63, %64, %cst_29 {dimension_numbers = #tpu.dot_dimension_numbers<[1], [0], [0], [1], [0, 0, 1, 1], [], []>} : vector<128x512xbf16>, vector<512x128xbf16>, vector<128x128xf32> -> vector<128x128xf32>
    %cst_30 = arith.constant 2.000000e-01 : f32
    %66 = vector.broadcast %cst_30 : f32 to vector<128x128xf32>
    %67 = arith.mulf %66, %65 : vector<128x128xf32>
    %68 = arith.maximumf %65, %67 : vector<128x128xf32>
    %69 = vector.shape_cast %68 : vector<128x128xf32> to vector<16x8x128xf32>
    %c1_31 = arith.constant 1 : index
    %c0_32 = arith.constant 0 : index
    %c0_33 = arith.constant 0 : index
    %70 = vector.load %arg9[%c1_31, %c0_32, %c0_33] : memref<18x8x128xf32, #tpu.memory_space<vmem>>, vector<16x8x128xf32>
    tpu.vector_store %arg9[%c1_31, %c0_32, %c0_33], %69 {strides = array<i32>} : memref<18x8x128xf32, #tpu.memory_space<vmem>>, vector<16x8x128xf32>,
    %c0_34 = arith.constant 0 : index
    %c0_35 = arith.constant 0 : index
    %c0_36 = arith.constant 0 : index
    %71 = vector.load %arg9[%c0_34, %c0_35, %c0_36] : memref<18x8x128xf32, #tpu.memory_space<vmem>>, vector<18x8x128xf32>
    %72 = vector.extract_strided_slice %71 {offsets = [0, 0, 0], sizes = [11, 8, 128], strides = [1, 1, 1]} : vector<18x8x128xf32> to vector<11x8x128xf32>
    %73 = vector.extract_strided_slice %71 {offsets = [1, 0, 0], sizes = [11, 8, 128], strides = [1, 1, 1]} : vector<18x8x128xf32> to vector<11x8x128xf32>
    %74 = vector.extract_strided_slice %71 {offsets = [2, 0, 0], sizes = [11, 8, 128], strides = [1, 1, 1]} : vector<18x8x128xf32> to vector<11x8x128xf32>
    %75 = vector.extract_strided_slice %71 {offsets = [3, 0, 0], sizes = [11, 8, 128], strides = [1, 1, 1]} : vector<18x8x128xf32> to vector<11x8x128xf32>
    %76 = vector.extract_strided_slice %71 {offsets = [4, 0, 0], sizes = [11, 8, 128], strides = [1, 1, 1]} : vector<18x8x128xf32> to vector<11x8x128xf32>
    %77 = vector.extract_strided_slice %71 {offsets = [5, 0, 0], sizes = [11, 8, 128], strides = [1, 1, 1]} : vector<18x8x128xf32> to vector<11x8x128xf32>
    %78 = vector.extract_strided_slice %71 {offsets = [6, 0, 0], sizes = [11, 8, 128], strides = [1, 1, 1]} : vector<18x8x128xf32> to vector<11x8x128xf32>
    %79 = vector.extract_strided_slice %71 {offsets = [7, 0, 0], sizes = [11, 8, 128], strides = [1, 1, 1]} : vector<18x8x128xf32> to vector<11x8x128xf32>
    %80 = tpu.concatenate %72, %73, %74, %75, %76, %77, %78, %79 in 2 : vector<11x8x128xf32>, vector<11x8x128xf32>, vector<11x8x128xf32>, vector<11x8x128xf32>, vector<11x8x128xf32>, vector<11x8x128xf32>, vector<11x8x128xf32>, vector<11x8x128xf32> -> vector<11x8x1024xf32>
    %81 = vector.shape_cast %80 : vector<11x8x1024xf32> to vector<88x1024xf32>
    %82 = arith.truncf %81 : vector<88x1024xf32> to vector<88x1024xbf16>
    %c0_37 = arith.constant 0 : index
    %c0_38 = arith.constant 0 : index
    %83 = vector.load %arg4[%c0_37, %c0_38] : memref<1024x128xbf16, #tpu.memory_space<vmem>>, vector<1024x128xbf16>
    %cst_39 = arith.constant dense<0.000000e+00> : vector<88x128xf32>
    %84 = tpu.matmul %82, %83, %cst_39 {dimension_numbers = #tpu.dot_dimension_numbers<[1], [0], [0], [1], [0, 0, 1, 1], [], []>} : vector<88x1024xbf16>, vector<1024x128xbf16>, vector<88x128xf32> -> vector<88x128xf32>
    %cst_40 = arith.constant 2.000000e-01 : f32
    %85 = vector.broadcast %cst_40 : f32 to vector<88x128xf32>
    %86 = arith.mulf %85, %84 : vector<88x128xf32>
    %87 = arith.maximumf %84, %86 : vector<88x128xf32>
    %88 = vector.shape_cast %87 : vector<88x128xf32> to vector<11x8x128xf32>
    %c1_41 = arith.constant 1 : index
    %c0_42 = arith.constant 0 : index
    %c0_43 = arith.constant 0 : index
    %89 = vector.load %arg10[%c1_41, %c0_42, %c0_43] : memref<13x8x128xf32, #tpu.memory_space<vmem>>, vector<11x8x128xf32>
    tpu.vector_store %arg10[%c1_41, %c0_42, %c0_43], %88 {strides = array<i32>} : memref<13x8x128xf32, #tpu.memory_space<vmem>>, vector<11x8x128xf32>,
    %c0_44 = arith.constant 0 : index
    %c0_45 = arith.constant 0 : index
    %c0_46 = arith.constant 0 : index
    %90 = vector.load %arg10[%c0_44, %c0_45, %c0_46] : memref<13x8x128xf32, #tpu.memory_space<vmem>>, vector<13x8x128xf32>
    %91 = vector.extract_strided_slice %90 {offsets = [0, 0, 0], sizes = [1, 8, 128], strides = [1, 1, 1]} : vector<13x8x128xf32> to vector<1x8x128xf32>
    %92 = vector.extract_strided_slice %90 {offsets = [2, 0, 0], sizes = [1, 8, 128], strides = [1, 1, 1]} : vector<13x8x128xf32> to vector<1x8x128xf32>
    %93 = vector.extract_strided_slice %90 {offsets = [4, 0, 0], sizes = [1, 8, 128], strides = [1, 1, 1]} : vector<13x8x128xf32> to vector<1x8x128xf32>
    %94 = vector.extract_strided_slice %90 {offsets = [6, 0, 0], sizes = [1, 8, 128], strides = [1, 1, 1]} : vector<13x8x128xf32> to vector<1x8x128xf32>
    %95 = vector.extract_strided_slice %90 {offsets = [8, 0, 0], sizes = [1, 8, 128], strides = [1, 1, 1]} : vector<13x8x128xf32> to vector<1x8x128xf32>
    %96 = vector.extract_strided_slice %90 {offsets = [10, 0, 0], sizes = [1, 8, 128], strides = [1, 1, 1]} : vector<13x8x128xf32> to vector<1x8x128xf32>
    %97 = tpu.concatenate %91, %92, %93, %94, %95, %96 in 0 : vector<1x8x128xf32>, vector<1x8x128xf32>, vector<1x8x128xf32>, vector<1x8x128xf32>, vector<1x8x128xf32>, vector<1x8x128xf32> -> vector<6x8x128xf32>
    %98 = vector.extract_strided_slice %90 {offsets = [1, 0, 0], sizes = [1, 8, 128], strides = [1, 1, 1]} : vector<13x8x128xf32> to vector<1x8x128xf32>
    %99 = vector.extract_strided_slice %90 {offsets = [3, 0, 0], sizes = [1, 8, 128], strides = [1, 1, 1]} : vector<13x8x128xf32> to vector<1x8x128xf32>
    %100 = vector.extract_strided_slice %90 {offsets = [5, 0, 0], sizes = [1, 8, 128], strides = [1, 1, 1]} : vector<13x8x128xf32> to vector<1x8x128xf32>
    %101 = vector.extract_strided_slice %90 {offsets = [7, 0, 0], sizes = [1, 8, 128], strides = [1, 1, 1]} : vector<13x8x128xf32> to vector<1x8x128xf32>
    %102 = vector.extract_strided_slice %90 {offsets = [9, 0, 0], sizes = [1, 8, 128], strides = [1, 1, 1]} : vector<13x8x128xf32> to vector<1x8x128xf32>
    %103 = vector.extract_strided_slice %90 {offsets = [11, 0, 0], sizes = [1, 8, 128], strides = [1, 1, 1]} : vector<13x8x128xf32> to vector<1x8x128xf32>
    %104 = tpu.concatenate %98, %99, %100, %101, %102, %103 in 0 : vector<1x8x128xf32>, vector<1x8x128xf32>, vector<1x8x128xf32>, vector<1x8x128xf32>, vector<1x8x128xf32>, vector<1x8x128xf32> -> vector<6x8x128xf32>
    %105 = vector.extract_strided_slice %97 {offsets = [0, 0, 0], sizes = [5, 8, 128], strides = [1, 1, 1]} : vector<6x8x128xf32> to vector<5x8x128xf32>
    %106 = vector.extract_strided_slice %104 {offsets = [0, 0, 0], sizes = [5, 8, 128], strides = [1, 1, 1]} : vector<6x8x128xf32> to vector<5x8x128xf32>
    %107 = vector.extract_strided_slice %97 {offsets = [1, 0, 0], sizes = [5, 8, 128], strides = [1, 1, 1]} : vector<6x8x128xf32> to vector<5x8x128xf32>
    %108 = vector.extract_strided_slice %104 {offsets = [1, 0, 0], sizes = [5, 8, 128], strides = [1, 1, 1]} : vector<6x8x128xf32> to vector<5x8x128xf32>
    %109 = tpu.concatenate %105, %106, %107, %108 in 2 : vector<5x8x128xf32>, vector<5x8x128xf32>, vector<5x8x128xf32>, vector<5x8x128xf32> -> vector<5x8x512xf32>
    %110 = vector.shape_cast %109 : vector<5x8x512xf32> to vector<40x512xf32>
    %111 = arith.truncf %110 : vector<40x512xf32> to vector<40x512xbf16>
    %c0_47 = arith.constant 0 : index
    %c0_48 = arith.constant 0 : index
    %112 = vector.load %arg5[%c0_47, %c0_48] : memref<512x256xbf16, #tpu.memory_space<vmem>>, vector<512x256xbf16>
    %cst_49 = arith.constant dense<0.000000e+00> : vector<40x256xf32>
    %113 = tpu.matmul %111, %112, %cst_49 {dimension_numbers = #tpu.dot_dimension_numbers<[1], [0], [0], [1], [0, 0, 1, 1], [], []>} : vector<40x512xbf16>, vector<512x256xbf16>, vector<40x256xf32> -> vector<40x256xf32>
    %cst_50 = arith.constant 2.000000e-01 : f32
    %114 = vector.broadcast %cst_50 : f32 to vector<40x256xf32>
    %115 = arith.mulf %114, %113 : vector<40x256xf32>
    %116 = arith.maximumf %113, %115 : vector<40x256xf32>
    %117 = vector.shape_cast %116 : vector<40x256xf32> to vector<5x8x256xf32>
    %c0_51 = arith.constant 0 : index
    %c0_52 = arith.constant 0 : index
    %c0_53 = arith.constant 0 : index
    %118 = vector.load %arg11[%c0_51, %c0_52, %c0_53] : memref<5x8x256xf32, #tpu.memory_space<vmem>>, vector<5x8x256xf32>
    tpu.vector_store %arg11[%c0_51, %c0_52, %c0_53], %117 {strides = array<i32>} : memref<5x8x256xf32, #tpu.memory_space<vmem>>, vector<5x8x256xf32>,
    %c0_54 = arith.constant 0 : index
    %c0_55 = arith.constant 0 : index
    %c0_56 = arith.constant 0 : index
    %119 = vector.load %arg11[%c0_54, %c0_55, %c0_56] : memref<5x8x256xf32, #tpu.memory_space<vmem>>, vector<5x8x256xf32>
    %120 = vector.extract_strided_slice %119 {offsets = [0, 0, 0], sizes = [1, 8, 256], strides = [1, 1, 1]} : vector<5x8x256xf32> to vector<1x8x256xf32>
    %121 = vector.extract_strided_slice %119 {offsets = [1, 0, 0], sizes = [1, 8, 256], strides = [1, 1, 1]} : vector<5x8x256xf32> to vector<1x8x256xf32>
    %122 = vector.extract_strided_slice %119 {offsets = [2, 0, 0], sizes = [1, 8, 256], strides = [1, 1, 1]} : vector<5x8x256xf32> to vector<1x8x256xf32>
    %123 = vector.extract_strided_slice %119 {offsets = [3, 0, 0], sizes = [1, 8, 256], strides = [1, 1, 1]} : vector<5x8x256xf32> to vector<1x8x256xf32>
    %124 = vector.extract_strided_slice %119 {offsets = [4, 0, 0], sizes = [1, 8, 256], strides = [1, 1, 1]} : vector<5x8x256xf32> to vector<1x8x256xf32>
    %125 = tpu.concatenate %120, %121, %122, %123, %124 in 2 : vector<1x8x256xf32>, vector<1x8x256xf32>, vector<1x8x256xf32>, vector<1x8x256xf32>, vector<1x8x256xf32> -> vector<1x8x1280xf32>
    %126 = vector.shape_cast %125 : vector<1x8x1280xf32> to vector<8x1280xf32>
    %127 = arith.truncf %126 : vector<8x1280xf32> to vector<8x1280xbf16>
    %c0_57 = arith.constant 0 : index
    %c0_58 = arith.constant 0 : index
    %128 = vector.load %arg6[%c0_57, %c0_58] : memref<1280x128xbf16, #tpu.memory_space<vmem>>, vector<1280x128xbf16>
    %cst_59 = arith.constant dense<0.000000e+00> : vector<8x128xf32>
    %129 = tpu.matmul %127, %128, %cst_59 {dimension_numbers = #tpu.dot_dimension_numbers<[1], [0], [0], [1], [0, 0, 1, 1], [], []>} : vector<8x1280xbf16>, vector<1280x128xbf16>, vector<8x128xf32> -> vector<8x128xf32>
    %c0_60 = arith.constant 0 : index
    %c0_61 = arith.constant 0 : index
    %130 = vector.load %arg7[%c0_60, %c0_61] : memref<8x128xf32, #tpu.memory_space<vmem>>, vector<8x128xf32>
    tpu.vector_store %arg7[%c0_60, %c0_61], %129 {strides = array<i32>} : memref<8x128xf32, #tpu.memory_space<vmem>>, vector<8x128xf32>,
    return
  }
  func.func @transform_0(%arg0: i32) -> (i32, i32) {
    %c0_i32 = arith.constant 0 : i32
    %c0_i32_0 = arith.constant 0 : i32
    return %arg0, %c0_i32 : i32, i32
  }
  func.func @transform_1(%arg0: i32) -> (i32, i32) {
    %c0_i32 = arith.constant 0 : i32
    %c0_i32_0 = arith.constant 0 : i32
    %c0_i32_1 = arith.constant 0 : i32
    return %c0_i32, %c0_i32_0 : i32, i32
  }
  func.func @transform_2(%arg0: i32) -> (i32, i32) {
    %c0_i32 = arith.constant 0 : i32
    %c0_i32_0 = arith.constant 0 : i32
    %c0_i32_1 = arith.constant 0 : i32
    return %c0_i32, %c0_i32_0 : i32, i32
  }
  func.func @transform_3(%arg0: i32) -> (i32, i32) {
    %c0_i32 = arith.constant 0 : i32
    %c0_i32_0 = arith.constant 0 : i32
    %c0_i32_1 = arith.constant 0 : i32
    return %c0_i32, %c0_i32_0 : i32, i32
  }
  func.func @transform_4(%arg0: i32) -> (i32, i32) {
    %c0_i32 = arith.constant 0 : i32
    %c0_i32_0 = arith.constant 0 : i32
    %c0_i32_1 = arith.constant 0 : i32
    return %c0_i32, %c0_i32_0 : i32, i32
  }
  func.func @transform_5(%arg0: i32) -> (i32, i32) {
    %c0_i32 = arith.constant 0 : i32
    %c0_i32_0 = arith.constant 0 : i32
    %c0_i32_1 = arith.constant 0 : i32
    return %c0_i32, %c0_i32_0 : i32, i32
  }
  func.func @transform_6(%arg0: i32) -> (i32, i32) {
    %c0_i32 = arith.constant 0 : i32
    %c0_i32_0 = arith.constant 0 : i32
    return %arg0, %c0_i32 : i32, i32
  }
}

</mosaic_0001>

<bundles_post_ra>
// kernel: forward.1
= control target key start
LH: loop header
LB: loop body
LE: loop exit
PB: predicated region body
PF: predicated region fallthrough
CT: control target
= control target key end

     0   :  { %11 = vsyncpa [#allocation7], 0  ;;  %s5553_s0 = inlined_call_operand.vmem [shape: f32[512,16], index: 0, kind: input, shape index: {}]   ;;  %s5554_s1 = inlined_call_operand.vmem [shape: bf16[16,128], index: 1, kind: input, shape index: {}]   ;;  %s5555_s2 = inlined_call_operand.hbm [shape: bf16[512,128], index: 2, kind: input, shape index: {}]   ;;  %s5556_s3 = inlined_call_operand.hbm [shape: bf16[1024,128], index: 3, kind: input, shape index: {}]   ;;  %s5557_s4 = inlined_call_operand.hbm [shape: bf16[512,256], index: 4, kind: input, shape index: {}]   ;;  %s5558_s5 = inlined_call_operand.vmem [shape: bf16[1280,128], index: 5, kind: input, shape index: {}]   ;;  %s5559_s6 = inlined_call_operand.hbm [shape: f32[16,128], index: 6, kind: output, shape index: {}]  }
   0x1   :  { %12 = vsyncpa [#allocation10], 0 }
   0x2   :  { %13 = vsyncpa [#allocation8], 0 }
   0x3   :  { %15 = vsyncpa [#allocation8 + $0x1], 0  ;;  %s4980_s21 = smov 0   ;;  %s4982_s22 = smov 0  }
   0x4   :  { %s4984_s23 = smov 0   ;;  %s4986_s24 = smov 0  }
   0x5 LB: > { %s5001_s25 = sadd.s32 4294967295, %s4933_s24   ;;  %s3667_s26 = sadd.s32 4294967294, %s4933_s24   ;;  %s4933_s24 = sphi %s4986_s24, %s5587_s24   ;;  %s4929_s23 = sphi %s4984_s23, %s5586_s23   ;;  %s4925_s22 = sphi %s4982_s22, %s5585_s22   ;;  %s4921_s21 = sphi %s4980_s21, %s5584_s21  }
   0x6   : > { %s5005_s27 = sadd.s32 1, %s4933_s24   ;;  %s159_s28 = sadd.s32 1, %s4929_s23 }
   0x7   : > { %s156_s29 = ssub.s32 %s4933_s24, %s5005_s27  ;;  %p169_p0 = scmp.ne.s32.totalorder %s4929_s23, %s4925_s22 }
   0x8   : > { %p157_p1 = scmp.eq.s32.totalorder %s156_s29, 0  ;;  %p170_p2 = scmp.eq.s32.totalorder %s5001_s25, 1 }
   0x9   : > { %p175_p3 = scmp.ne.s32.totalorder %s4925_s22, %s4921_s21  ;;  %p176_p4 = scmp.eq.s32.totalorder %s3667_s26, 1 }
   0xa   : > { %s5016_s30 = scalar_select %p157_p1, %s4929_s23, %s159_s28  }
   0xb   : > { %p5018_p5 = por %p170_p2, %p169_p0  ;;  %p5022_p6 = por %p176_p4, %p175_p3 }
   0xc   : > { %p3668_p7 = scmp.ge.s32.totalorder %s4933_s24, 1  ;;  %p183_p8 = scmp.lt.s32.totalorder %s4933_s24, 3 }
   0xd   : > { %s5563_s7 = scalar_select %p5018_p5, 1, 0 }
   0xe   : > { %s5564_s8 = scalar_select %p5022_p6, 1, 0 }
   0xf   : > { %p5560_p9 = scmp.eq.s32.totalorder %s5001_s25, 0  ;;  %p5029_p10 = pnand %p3668_p7, %p183_p8 }
  0x10   : > { %s4935_s10 = smov [#allocation9]   ;;  %s4936_s13 = smov [#allocation6]  }
  0x11   : > { %p4452_p11 = pneg %p5029_p10  ;;  %s211_s11 = sshll.u32 %s4935_s10, 4  ;;  %s212_s11 = int_to_ptr.vmem [resolvable:$true] %s211_s11 }
  0x12   : > { %s198_s14 = sshll.u32 %s4936_s13, 4  ;;  %s4937_s15 = smov [#allocation11]   ;;  %s199_s14 = int_to_ptr.vmem [resolvable:$true] %s198_s14 }
  0x13   : > { %p5037_p12 = pnand %p5560_p9, %p4452_p11  ;;  %s224_s16 = sshll.u32 %s4937_s15, 4  ;;  %s225_s16 = int_to_ptr.vmem [resolvable:$true] %s224_s16 }
  0x14   : > { %s4798_s17 = scalar_lea.vmem %s212_s11, 8192  ;;  %p4806_p3 = scmp.lt.s32.totalorder %s212_s11, %s212_s11 }
  0x15   : > { %p4789_p13 = pneg %p5037_p12  ;;  %p4799_p0 = scmp.ne.s32.totalorder %s212_s11, %s4798_s17 }
  0x16   : > { %p4807_p4 = scmp.lt.s32.totalorder %s4798_s17, %s4798_s17 }
  0x17   : > { %p4801_p1 = pnand %p4799_p0, %p4789_p13 }
  0x18   : > { %p4808_p7 = por %p4807_p4, %p4806_p3 }
  0x19   : > { %p4802_p2 = pneg %p4801_p1 }
  0x1b   : > { %p4809_p8 = pnand %p4808_p7, %p4802_p2 }
  0x1d   : > { %4812 = shalt.err (!%p4809_p8)
}
  0x1e   : > { %s4938_s18 = smov 64   ;;  %s4939_s19 = smov 4  }
  0x1f   : > { %4458 = dma.hbm_to_vmem [thread:$0]  (!%p5037_p12), %s5556_s3, 8192, %s212_s11, [#allocation10], %s4938_s18, %s4938_s18, %s4939_s19  }
  0x20   : > { %s4824_s28 = scalar_lea.vmem %s199_s14, 4096  ;;  %p4832_p9 = scmp.lt.s32.totalorder %s199_s14, %s199_s14 }
  0x21   : > { %p4825_p11 = scmp.ne.s32.totalorder %s199_s14, %s4824_s28  ;;  %p4833_p6 = scmp.lt.s32.totalorder %s4824_s28, %s4824_s28 }
  0x23   : > { %p4827_p0 = pnand %p4825_p11, %p4789_p13  ;;  %p4834_p3 = por %p4833_p6, %p4832_p9 }
  0x25   : > { %p4828_p1 = pneg %p4827_p0 }
  0x27   : > { %p4835_p2 = pnand %p4834_p3, %p4828_p1 }
  0x29   : > { %4838 = shalt.err (!%p4835_p2)
}
  0x2a   : > { %4455 = dma.hbm_to_vmem [thread:$0]  (!%p5037_p12), %s5555_s2, 4096, %s199_s14, [#allocation7], %s4938_s18, %s4938_s18, %s4939_s19  }
  0x2b   : > { %s4850_s11 = scalar_lea.vmem %s225_s16, 8192  ;;  %p4858_p11 = scmp.lt.s32.totalorder %s225_s16, %s225_s16 }
  0x2c   : > { %p4851_p4 = scmp.ne.s32.totalorder %s225_s16, %s4850_s11  ;;  %p4859_p0 = scmp.lt.s32.totalorder %s4850_s11, %s4850_s11 }
  0x2e   : > { %p4853_p7 = pnand %p4851_p4, %p4789_p13  ;;  %p4860_p5 = por %p4859_p0, %p4858_p11 }
  0x30   : > { %p4854_p8 = pneg %p4853_p7 }
  0x32   : > { %p4861_p6 = pnand %p4860_p5, %p4854_p8 }
  0x34   : > { %4864 = shalt.err (!%p4861_p6)
}
  0x35   : > { %s4940_s13 = smov 128   ;;  %s4941_s15 = smov 8  }
  0x36   : > { %4461 = dma.hbm_to_vmem [thread:$0]  (!%p5037_p12), %s5557_s4, 8192, %s225_s16, [#allocation10], %s4940_s13, %s4940_s13, %s4941_s15  }
  0x37   : > { %252 = sbr.rel (%p5029_p10) target bundleno = 1256 (0x4e8), region = 44 }
  0x3c   : > { %p5567_p9 = scmp.eq.s32.totalorder %s5001_s25, 0 }
  0x3e   : > { %4908 = dma.done.wait (%p5567_p9), [#allocation7], 4096   ;;  %p5568_p13 = pmov %p5567_p9 }
  0x3f   : > { %p5569_p5 = pmov %p5567_p9 }
  0x40   : > { %4910 = vsyncadd (%p5568_p13), [#allocation7], 4294963200 }
  0x41   : > { %4912 = dma.done.wait (%p5569_p5), [#allocation10], 16384   ;;  %p5570_p1 = pmov %p5569_p5 }
  0x42   : > { %s3678_s12 = sshll.u32 %s5001_s25, 5  ;;  %v4514_v0 = vld [vmem:[%s5554_s1] sm:$0xff]   ;;  %vm362_vm0 = vcmask 130048   ;;  %v4515_v16 = vld [vmem:[#allocation6 + $0xf8] sm:$0xff]   ;;  %v4517_v22 = vld [vmem:[#allocation6 + $0xf0] sm:$0xff]   ;;  %s287_s16 = sand.u32 1, %s4925_s22  }
  0x43   : > { %4914 = vsyncadd (%p5570_p1), [#allocation10], 4294950912  ;;  %p291_p3 = scmp.lt.s32.totalorder %s3678_s12, 63  ;;  %4404 = vmatprep.subr.bf16.mxu0 %v4514_v0  ;;  %v4516_v19 = vld [vmem:[#allocation6 + $0xb8] sm:$0xff]   ;;  %v4518_v23 = vld [vmem:[#allocation6 + $0xb0] sm:$0xff]   ;;  %s3677_s9 = sshll.u32 %s287_s16, 3 }
  0x44   : > { %4405 = vmatpush3.bf16.msra.mxu0 %v4514_v0  ;;  %v4519_v24 = vld [vmem:[#allocation6 + $0xe8] sm:$0xff]   ;;  %v4521_v28 = vld [vmem:[#allocation6 + $0xe0] sm:$0xff]   ;;  %v4523_v29 = vld [vmem:[#allocation6 + $0x78] sm:$0xff]   ;;  %s289_s19 = scalar_lea.vmem [#allocation12], %s3677_s9  ;;  %s3564_s11 = scalar_lea.sflag [#allocation8], %s287_s16 }
  0x45   : > { %s5589_s12 = smov (!%p291_p3, %s3678_s12), 63  ;;  %4022 = vmatprep.subr.bf16.mxu0 %v4515_v16  ;;  %v4520_v26 = vld [vmem:[#allocation6 + $0xa8] sm:$0xff]   ;;  %v4522_v32 = vld [vmem:[#allocation6 + $0xa0] sm:$0xff]   ;;  %v4524_v33 = vld [vmem:[#allocation6 + $0x38] sm:$0xff]   ;;  %3958 = vmatprep.subr.bf16.mxu1 %v4523_v29  ;;  %s3577_s26 = sshll.u32 %s289_s19, 4  ;;  %s3578_s26 = int_to_ptr.vmem [resolvable:$true] %s3577_s26 }
  0x46   : > { %s3679_s14 = sshll.u32 %s5589_s12, 3  ;;  %v4525_v36 = vld [vmem:[#allocation6 + $0x70] sm:$0xff]   ;;  %v4526_v37 = vld [vmem:[#allocation6 + $0xd8] sm:$0xff]   ;;  %3959 = vmatpush3.bf16.msra.mxu1 %v4524_v33  ;;  %v4529_v41 = vld [vmem:[#allocation6 + $0x68] sm:$0xff]   ;;  %s4865_s13 = scalar_lea.vmem %s3578_s26, 128 }
  0x47   : > { %s5081_s18 = scalar_lea.vmem %s5553_s0, %s3679_s14  ;;  %v4527_v38 = vld [vmem:[#allocation6 + $0x30] sm:$0xff]   ;;  %3960 = vmatprep.subr.bf16.mxu1 %v4525_v36  ;;  %v4528_v39 = vld [vmem:[#allocation6 + $0x98] sm:$0xff]   ;;  %v4530_v43 = vld [vmem:[#allocation6 + $0x28] sm:$0xff]   ;;  %v5562_v36 = vmov 0.0   ;;  %p4866_p10 = scmp.ne.s32.totalorder %s3578_s26, %s4865_s13 }
  0x48   : > { %v306_v1 = vld [vmem:[%s5081_s18] sm:$0xff]  ;;  %v307_v2 = vld [vmem:[%s5081_s18 + $0x8] sm:$0xff]  ;;  %v308_v3 = vld [vmem:[%s5081_s18 + $0x10] sm:$0xff]  ;;  %p5582_p12 = scmp.ne.s32.totalorder %s5563_s7, 0  ;;  %s4944_s15 = smov [#allocation12]  }
  0x49   : > { %v338_v4 = vpack.c.bf16 %v307_v2, %v306_v1  ;;  %v309_v5 = vld [vmem:[%s5081_s18 + $0x18] sm:$0xff]  ;;  %v310_v6 = vld [vmem:[%s5081_s18 + $0x20] sm:$0xff]  ;;  %v311_v7 = vld [vmem:[%s5081_s18 + $0x28] sm:$0xff] }
  0x4a   : > { %v339_v8 = vpack.c.bf16 %v309_v5, %v308_v3  ;;  %v340_v9 = vpack.c.bf16 %v311_v7, %v310_v6  ;;  %v312_v10 = vld [vmem:[%s5081_s18 + $0x30] sm:$0xff]  ;;  %v313_v11 = vld [vmem:[%s5081_s18 + $0x38] sm:$0xff]  ;;  %v314_v12 = vld [vmem:[%s5081_s18 + $0x40] sm:$0xff]  ;;  %3961 = vmatpush3.bf16.msra.mxu1 %v4527_v38  ;;  %p4867_p2 = pnand %p4866_p10, %p5582_p12 }
  0x4b   : > { %4406 = vmatprep.mubr.msk.bf16.mxu0 %vm362_vm0, %v338_v4  ;;  %v315_v13 = vld [vmem:[%s5081_s18 + $0x48] sm:$0xff]  ;;  %v341_v14 = vpack.c.bf16 %v313_v11, %v312_v10  ;;  %v316_v17 = vld [vmem:[%s5081_s18 + $0x50] sm:$0xff]  ;;  %v317_v18 = vld [vmem:[%s5081_s18 + $0x58] sm:$0xff]  ;;  %3962 = vmatprep.subr.bf16.mxu1 %v4529_v41 }
  0x4c   : > { %4407 = vmatmul.mubr.msk.bf16.vlgmr.msra.gmra.mxu0 %vm362_vm0, %v339_v8  ;;  %v342_v15 = vpack.c.bf16 %v315_v13, %v314_v12  ;;  %v318_v20 = vld [vmem:[%s5081_s18 + $0x60] sm:$0xff]  ;;  %v319_v21 = vld [vmem:[%s5081_s18 + $0x68] sm:$0xff]  ;;  %v343_v25 = vpack.c.bf16 %v317_v18, %v316_v17  ;;  %v320_v30 = vld [vmem:[%s5081_s18 + $0x70] sm:$0xff]  ;;  %p4868_p4 = pneg %p4867_p2 }
  0x4d   : > { %4410 = vmatprep.mubr.msk.bf16.mxu0 %vm362_vm0, %v340_v9  ;;  %4023 = vmatpush3.bf16.msra.mxu0 %v4516_v19  ;;  %v344_v27 = vpack.c.bf16 %v319_v21, %v318_v20  ;;  %v321_v31 = vld [vmem:[%s5081_s18 + $0x78] sm:$0xff]  ;;  %v322_v34 = vld [vmem:[%s5081_s18 + $0x80] sm:$0xff]  ;;  %v323_v35 = vld [vmem:[%s5081_s18 + $0x88] sm:$0xff] }
  0x4e   : > { %4024 = vmatprep.subr.bf16.mxu0 %v4517_v22  ;;  %v345_v40 = vpack.c.bf16 %v321_v31, %v320_v30  ;;  %v346_v42 = vpack.c.bf16 %v323_v35, %v322_v34  ;;  %v4531_v44 = vld [vmem:[#allocation6 + $0x60] sm:$0xff]   ;;  %v324_v45 = vld [vmem:[%s5081_s18 + $0x90] sm:$0xff]  ;;  %v325_v46 = vld [vmem:[%s5081_s18 + $0x98] sm:$0xff]  ;;  %3963 = vmatpush3.bf16.msra.mxu1 %v4530_v43 }
  0x4f   : > { %v4532_v47 = vld [vmem:[#allocation6 + $0xd0] sm:$0xff]   ;;  %v326_v48 = vld [vmem:[%s5081_s18 + $0xa0] sm:$0xff]  ;;  %v327_v49 = vld [vmem:[%s5081_s18 + $0xa8] sm:$0xff]  ;;  %3964 = vmatprep.subr.bf16.mxu1 %v4531_v44  ;;  %v347_v53 = vpack.c.bf16 %v325_v46, %v324_v45 }
  0x50   : > { %v4534_v50 = vld [vmem:[#allocation6 + $0x90] sm:$0xff]   ;;  %v4533_v51 = vld [vmem:[#allocation6 + $0x20] sm:$0xff]   ;;  %v4535_v52 = vld [vmem:[#allocation6 + $0x58] sm:$0xff]   ;;  %v348_v55 = vpack.c.bf16 %v327_v49, %v326_v48 }
  0x51   : > { %4025 = vmatpush3.bf16.msra.mxu0 %v4518_v23  ;;  %v4536_v54 = vld [vmem:[#allocation6 + $0x18] sm:$0xff]   ;;  %v328_v56 = vld [vmem:[%s5081_s18 + $0xb0] sm:$0xff]  ;;  %v330_v58 = vld [vmem:[%s5081_s18 + $0xc0] sm:$0xff] }
  0x52   : > { %4026 = vmatprep.subr.bf16.mxu0 %v4519_v24  ;;  %3965 = vmatpush3.bf16.msra.mxu1 %v4533_v51  ;;  %v329_v57 = vld [vmem:[%s5081_s18 + $0xb8] sm:$0xff]  ;;  %v331_v59 = vld [vmem:[%s5081_s18 + $0xc8] sm:$0xff]  ;;  %v332_v62 = vld [vmem:[%s5081_s18 + $0xd0] sm:$0xff] }
  0x53   : > { %3966 = vmatprep.subr.bf16.mxu1 %v4535_v52  ;;  %v349_v60 = vpack.c.bf16 %v329_v57, %v328_v56  ;;  %v350_v61 = vpack.c.bf16 %v331_v59, %v330_v58  ;;  %v333_v63 = vld [vmem:[%s5081_s18 + $0xd8] sm:$0xff]  ;;  %v334_v0 = vld [vmem:[%s5081_s18 + $0xe0] sm:$0xff]  ;;  %v335_v1 = vld [vmem:[%s5081_s18 + $0xe8] sm:$0xff] }
  0x54   : > { %4411 = vmatmul.mubr.msk.bf16.gmra.mxu0 %vm362_vm0, %v341_v14  ;;  %v351_v2 = vpack.c.bf16 %v333_v63, %v332_v62  ;;  %v352_v3 = vpack.c.bf16 %v335_v1, %v334_v0  ;;  %v336_v4 = vld [vmem:[%s5081_s18 + $0xf0] sm:$0xff]  ;;  %v337_v5 = vld [vmem:[%s5081_s18 + $0xf8] sm:$0xff]  ;;  %v4538_v9 = vld [vmem:[#allocation6 + $0xc8] sm:$0xff]   ;;  %s3938_s18 = sshll.u32 %s5001_s25, 7  ;;  %s4869_s25 = sshll.u32 %s4944_s15, 4  ;;  %s4870_s25 = int_to_ptr.vmem [resolvable:$false] %s4869_s25 }
  0x55   : > { %4414 = vmatprep.mubr.msk.bf16.mxu0 %vm362_vm0, %v342_v15  ;;  %4027 = vmatpush3.bf16.msra.mxu0 %v4520_v26  ;;  %v353_v6 = vpack.c.bf16 %v337_v5, %v336_v4  ;;  %v4537_v7 = vld [vmem:[#allocation6 + $0x50] sm:$0xff]   ;;  %v4541_v10 = vld [vmem:[#allocation6 + $0x48] sm:$0xff]   ;;  %v4543_v13 = vld [vmem:[#allocation6 + $0x40] sm:$0xff]   ;;  %s3575_s10 = scalar_lea.hbm %s5559_s6, %s3938_s18  ;;  %s4871_s17 = scalar_lea.vmem %s4870_s25, 256 }
  0x56   : > { %4028 = vmatprep.subr.bf16.mxu0 %v4521_v28  ;;  %3967 = vmatpush3.bf16.msra.mxu1 %v4536_v54  ;;  %v4539_v8 = vld [vmem:[#allocation6 + $0x10] sm:$0xff]   ;;  %v4542_v11 = vld [vmem:[#allocation6 + $0x8] sm:$0xff]   ;;  %v4545_v14 = vld [vmem:[#allocation6] sm:$0xff]   ;;  %p4872_p7 = scmp.lt.s32.totalorder %s3578_s26, %s4870_s25  ;;  %p4873_p8 = scmp.lt.s32.totalorder %s4871_s17, %s4865_s13 }
  0x57   : > { %3968 = vmatprep.subr.bf16.mxu1 %v4537_v7  ;;  %v4540_v12 = vld [vmem:[#allocation6 + $0x88] sm:$0xff]   ;;  %v4544_v15 = vld [vmem:[#allocation6 + $0xc0] sm:$0xff]   ;;  %v4547_v17 = vld [vmem:[#allocation9 + $0x78] sm:$0xff]  }
  0x58   : > { %v4546_v16 = vld [vmem:[#allocation6 + $0x80] sm:$0xff]   ;;  %v4549_v18 = vld [vmem:[#allocation9 + $0xf8] sm:$0xff]   ;;  %v4551_v38 = vld [vmem:[#allocation9 + $0x70] sm:$0xff]   ;;  %p4874_p11 = por %p4873_p8, %p4872_p7 }
  0x59   : > { %4029 = vmatpush3.bf16.msra.mxu0 %v4522_v32  ;;  %v4548_v34 = vld [vmem:[#allocation9 + $0x38] sm:$0xff]   ;;  %v4552_v44 = vld [vmem:[#allocation9 + $0x30] sm:$0xff]   ;;  %v4555_v49 = vld [vmem:[#allocation9 + $0x68] sm:$0xff]  }
  0x5a   : > { %4030 = vmatprep.subr.bf16.mxu0 %v4526_v37  ;;  %3969 = vmatpush3.bf16.msra.mxu1 %v4539_v8  ;;  %v4550_v48 = vld [vmem:[#allocation9 + $0xb8] sm:$0xff]   ;;  %v4553_v52 = vld [vmem:[#allocation9 + $0xf0] sm:$0xff]   ;;  %v4556_v57 = vld [vmem:[#allocation9 + $0x28] sm:$0xff]   ;;  %p4875_p0 = pnand %p4874_p11, %p4868_p4 }
  0x5b   : > { %3970 = vmatprep.subr.bf16.mxu1 %v4541_v10  ;;  %v4557_v63 = vld [vmem:[#allocation9 + $0xe8] sm:$0xff]   ;;  %v4560_v4 = vld [vmem:[#allocation9 + $0x20] sm:$0xff]  }
  0x5c   : > { %4415 = vmatmul.mubr.msk.bf16.gmra.mxu0 %vm362_vm0, %v343_v25  ;;  %v4558_v8 = vld [vmem:[#allocation9 + $0xa8] sm:$0xff]  }
  0x5d   : > { %4418 = vmatprep.mubr.msk.bf16.mxu0 %vm362_vm0, %v344_v27  ;;  %4031 = vmatpush3.bf16.msra.mxu0 %v4528_v39 }
  0x5e   : > { %4032 = vmatprep.subr.bf16.mxu0 %v4532_v47  ;;  %3971 = vmatpush3.bf16.msra.mxu1 %v4542_v11 }
  0x5f   : > { %3972 = vmatprep.subr.bf16.mxu1 %v4543_v13 }
  0x61   : > { %4033 = vmatpush3.bf16.msra.mxu0 %v4534_v50 }
  0x62   : > { %4034 = vmatprep.subr.bf16.mxu0 %v4538_v9  ;;  %3973 = vmatpush3.bf16.msra.mxu1 %v4545_v14  ;;  %v4563_v9 = vld [vmem:[#allocation9 + $0x58] sm:$0xff]  }
  0x63   : > { %4086 = vmatprep.subr.bf16.mxu1 %v4547_v17  ;;  %v4564_v17 = vld [vmem:[#allocation9 + $0x18] sm:$0xff]  }
  0x64   : > { %4419 = vmatmul.mubr.msk.bf16.gmra.mxu0 %vm362_vm0, %v345_v40 }
  0x65   : > { %4422 = vmatprep.mubr.msk.bf16.mxu0 %vm362_vm0, %v346_v42  ;;  %4035 = vmatpush3.bf16.msra.mxu0 %v4540_v12  ;;  %v4561_v12 = vld [vmem:[#allocation9 + $0xe0] sm:$0xff]  }
  0x66   : > { %4036 = vmatprep.subr.bf16.mxu0 %v4544_v15 }
  0x69   : > { %4037 = vmatpush3.bf16.msra.mxu0 %v4546_v16 }
  0x6a   : > { %4138 = vmatprep.subr.bf16.mxu0 %v4549_v18 }
  0x6c   : > { %4423 = vmatmul.mubr.msk.bf16.gmra.mxu0 %vm362_vm0, %v347_v53 }
  0x6d   : > { %4426 = vmatprep.mubr.msk.bf16.mxu0 %vm362_vm0, %v348_v55 }
  0x74   : > { %4427 = vmatmul.mubr.msk.bf16.gmra.mxu0 %vm362_vm0, %v349_v60  ;;  %v4554_v60 = vld [vmem:[#allocation9 + $0xb0] sm:$0xff]  }
  0x75   : > { %4430 = vmatprep.mubr.msk.bf16.mxu0 %vm362_vm0, %v350_v61  ;;  %v4559_v61 = vld [vmem:[#allocation9 + $0x60] sm:$0xff]  }
  0x7c   : > { %4431 = vmatmul.mubr.msk.bf16.gmra.mxu0 %vm362_vm0, %v351_v2 }
  0x7d   : > { %4434 = vmatprep.mubr.msk.bf16.mxu0 %vm362_vm0, %v352_v3 }
  0x84   : > { %4435 = vmatmul.mubr.msk.bf16.gmra.mxu0 %vm362_vm0, %v353_v6 }
 0x10c   : > { %v4408_v19 = vpop.f32.mrf.mxu0 }
 0x10d   : > { %v574_v20 = vmul.f32 0.2, %v4408_v19 }
 0x10e   : > { %v445_v21 = vpop.f32.mrf.mxu0 }
 0x10f   : > { %v572_v22 = vmul.f32 0.2, %v445_v21  ;;  %v606_v24 = vmax.f32 %v4408_v19, %v574_v20  ;;  %v4562_v20 = vld [vmem:[#allocation9 + $0xa0] sm:$0xff]  }
 0x110   : > { %v4409_v23 = vpop.f32.mrf.mxu0 }
 0x111   : > { %v604_v25 = vmax.f32 %v445_v21, %v572_v22  ;;  %v575_v32 = vmul.f32 0.2, %v4409_v23  ;;  %v4565_v22 = vld [vmem:[#allocation9 + $0xd8] sm:$0xff]  }
 0x112   : > { %v448_v26 = vpop.f32.mrf.mxu0 }
 0x113   : > { %v573_v27 = vmul.f32 0.2, %v448_v26  ;;  %v704_v28 = vpack.c.bf16 %v606_v24, %v604_v25  ;;  %v607_v42 = vmax.f32 %v4409_v23, %v575_v32 }
 0x114   : > { %v4412_v29 = vpop.f32.mrf.mxu0 }
 0x115   : > { %v605_v30 = vmax.f32 %v448_v26, %v573_v27  ;;  %v578_v31 = vmul.f32 0.2, %v4412_v29  ;;  %1023 = vmatprep.mubr.bf16.mxu1 %v704_v28 }
 0x116   : > { %v461_v33 = vpop.f32.mrf.mxu0 }
 0x117   : > { %v576_v35 = vmul.f32 0.2, %v461_v33  ;;  %v703_v37 = vpack.c.bf16 %v605_v30, %v5562_v36  ;;  %v610_v40 = vmax.f32 %v4412_v29, %v578_v31  ;;  %v705_v50 = vpack.c.bf16 %v607_v42, %v605_v30  ;;  %v4566_v30 = vld [vmem:[#allocation9 + $0x98] sm:$0xff]  }
 0x118   : > { %v4413_v39 = vpop.f32.mrf.mxu0 }
 0x119   : > { %v608_v41 = vmax.f32 %v461_v33, %v576_v35  ;;  %1024 = vmatmul.mubr.bf16.vlgmr.msra.gmra.mxu1 %v703_v37  ;;  %v579_v55 = vmul.f32 0.2, %v4413_v39 }
 0x11a   : > { %v464_v43 = vpop.f32.mrf.mxu0  ;;  %4087 = vmatpush3.bf16.msra.mxu1 %v4548_v34 }
 0x11b   : > { %v706_v45 = vpack.c.bf16 %v608_v41, %v606_v24  ;;  %v708_v46 = vpack.c.bf16 %v610_v40, %v608_v41  ;;  %v577_v47 = vmul.f32 0.2, %v464_v43  ;;  %4088 = vmatprep.subr.bf16.mxu1 %v4551_v38  ;;  %v611_v2 = vmax.f32 %v4413_v39, %v579_v55 }
 0x11c   : > { %v4416_v51 = vpop.f32.mrf.mxu0 }
 0x11d   : > { %v609_v53 = vmax.f32 %v464_v43, %v577_v47  ;;  %v582_v54 = vmul.f32 0.2, %v4416_v51  ;;  %1031 = vmatprep.mubr.bf16.mxu1 %v708_v46  ;;  %1120 = vmatprep.mubr.bf16.mxu0 %v706_v45 }
 0x11e   : > { %v477_v56 = vpop.f32.mrf.mxu0  ;;  %1121 = vmatmul.mubr.bf16.vlgmr.msra.gmra.mxu0 %v705_v50  ;;  %4089 = vmatpush3.bf16.msra.mxu1 %v4552_v44 }
 0x11f   : > { %v580_v58 = vmul.f32 0.2, %v477_v56  ;;  %v707_v59 = vpack.c.bf16 %v609_v53, %v607_v42  ;;  %4139 = vmatpush3.bf16.msra.mxu0 %v4550_v48  ;;  %4090 = vmatprep.subr.bf16.mxu1 %v4555_v49  ;;  %v614_v0 = vmax.f32 %v4416_v51, %v582_v54  ;;  %v709_v11 = vpack.c.bf16 %v611_v2, %v609_v53 }
 0x120   : > { %v4417_v62 = vpop.f32.mrf.mxu0  ;;  %4140 = vmatprep.subr.bf16.mxu0 %v4553_v52 }
 0x121   : > { %v612_v1 = vmax.f32 %v477_v56, %v580_v58  ;;  %1032 = vmatmul.mubr.bf16.gmra.mxu1 %v707_v59  ;;  %v583_v15 = vmul.f32 0.2, %v4417_v62 }
 0x122   : > { %v480_v3 = vpop.f32.mrf.mxu0  ;;  %4091 = vmatpush3.bf16.msra.mxu1 %v4556_v57 }
 0x123   : > { %v710_v5 = vpack.c.bf16 %v612_v1, %v610_v40  ;;  %v712_v6 = vpack.c.bf16 %v614_v0, %v612_v1  ;;  %v581_v7 = vmul.f32 0.2, %v480_v3  ;;  %4141 = vmatpush3.bf16.msra.mxu0 %v4554_v60  ;;  %4092 = vmatprep.subr.bf16.mxu1 %v4559_v61  ;;  %v615_v25 = vmax.f32 %v4417_v62, %v583_v15 }
 0x124   : > { %v4420_v10 = vpop.f32.mrf.mxu0  ;;  %4142 = vmatprep.subr.bf16.mxu0 %v4557_v63 }
 0x125   : > { %v613_v13 = vmax.f32 %v480_v3, %v581_v7  ;;  %v586_v14 = vmul.f32 0.2, %v4420_v10  ;;  %1039 = vmatprep.mubr.bf16.mxu1 %v712_v6  ;;  %1128 = vmatprep.mubr.bf16.mxu0 %v710_v5 }
 0x126   : > { %v493_v16 = vpop.f32.mrf.mxu0  ;;  %1129 = vmatmul.mubr.bf16.gmra.mxu0 %v709_v11  ;;  %4093 = vmatpush3.bf16.msra.mxu1 %v4560_v4 }
 0x127   : > { %v584_v18 = vmul.f32 0.2, %v493_v16  ;;  %v711_v19 = vpack.c.bf16 %v613_v13, %v611_v2  ;;  %4143 = vmatpush3.bf16.msra.mxu0 %v4558_v8  ;;  %4094 = vmatprep.subr.bf16.mxu1 %v4563_v9  ;;  %v618_v23 = vmax.f32 %v4420_v10, %v586_v14  ;;  %v713_v32 = vpack.c.bf16 %v615_v25, %v613_v13 }
 0x128   : > { %v4421_v21 = vpop.f32.mrf.mxu0  ;;  %4144 = vmatprep.subr.bf16.mxu0 %v4561_v12 }
 0x129   : > { %v616_v24 = vmax.f32 %v493_v16, %v584_v18  ;;  %1040 = vmatmul.mubr.bf16.gmra.mxu1 %v711_v19  ;;  %v587_v35 = vmul.f32 0.2, %v4421_v21 }
 0x12a   : > { %v496_v26 = vpop.f32.mrf.mxu0  ;;  %4095 = vmatpush3.bf16.msra.mxu1 %v4564_v17 }
 0x12b   : > { %v714_v27 = vpack.c.bf16 %v616_v24, %v614_v0  ;;  %v716_v28 = vpack.c.bf16 %v618_v23, %v616_v24  ;;  %v585_v29 = vmul.f32 0.2, %v496_v26  ;;  %4145 = vmatpush3.bf16.msra.mxu0 %v4562_v20  ;;  %v619_v43 = vmax.f32 %v4421_v21, %v587_v35 }
 0x12c   : > { %v4424_v31 = vpop.f32.mrf.mxu0  ;;  %4146 = vmatprep.subr.bf16.mxu0 %v4565_v22 }
 0x12d   : > { %v617_v33 = vmax.f32 %v496_v26, %v585_v29  ;;  %v590_v34 = vmul.f32 0.2, %v4424_v31  ;;  %1047 = vmatprep.mubr.bf16.mxu1 %v716_v28  ;;  %1136 = vmatprep.mubr.bf16.mxu0 %v714_v27 }
 0x12e   : > { %v509_v37 = vpop.f32.mrf.mxu0  ;;  %1137 = vmatmul.mubr.bf16.gmra.mxu0 %v713_v32 }
 0x12f   : > { %v588_v38 = vmul.f32 0.2, %v509_v37  ;;  %v715_v39 = vpack.c.bf16 %v617_v33, %v615_v25  ;;  %4147 = vmatpush3.bf16.msra.mxu0 %v4566_v30  ;;  %v622_v41 = vmax.f32 %v4424_v31, %v590_v34  ;;  %v717_v49 = vpack.c.bf16 %v619_v43, %v617_v33 }
 0x130   : > { %v4425_v40 = vpop.f32.mrf.mxu0 }
 0x131   : > { %v620_v42 = vmax.f32 %v509_v37, %v588_v38  ;;  %1048 = vmatmul.mubr.bf16.gmra.mxu1 %v715_v39  ;;  %v591_v52 = vmul.f32 0.2, %v4425_v40 }
 0x132   : > { %v512_v44 = vpop.f32.mrf.mxu0 }
 0x133   : > { %v718_v45 = vpack.c.bf16 %v620_v42, %v618_v23  ;;  %v720_v46 = vpack.c.bf16 %v622_v41, %v620_v42  ;;  %v589_v47 = vmul.f32 0.2, %v512_v44  ;;  %v623_v59 = vmax.f32 %v4425_v40, %v591_v52  ;;  %v4567_v40 = vld [vmem:[#allocation9 + $0x50] sm:$0xff]   ;;  %v4579_v52 = vld [vmem:[#allocation9 + $0x178] sm:$0xff]  }
 0x134   : > { %v4428_v48 = vpop.f32.mrf.mxu0  ;;  %4096 = vmatprep.subr.bf16.mxu1 %v4567_v40  ;;  %v4569_v42 = vld [vmem:[#allocation9 + $0xd0] sm:$0xff]  }
 0x135   : > { %v621_v50 = vmax.f32 %v512_v44, %v589_v47  ;;  %v594_v51 = vmul.f32 0.2, %v4428_v48  ;;  %1055 = vmatprep.mubr.bf16.mxu1 %v720_v46  ;;  %1144 = vmatprep.mubr.bf16.mxu0 %v718_v45  ;;  %v4572_v44 = vld [vmem:[#allocation9 + $0x8] sm:$0xff]   ;;  %v4570_v45 = vld [vmem:[#allocation9 + $0x90] sm:$0xff]   ;;  %v4575_v46 = vld [vmem:[#allocation9 + $0x40] sm:$0xff]  }
 0x136   : > { %v525_v53 = vpop.f32.mrf.mxu0  ;;  %1145 = vmatmul.mubr.bf16.gmra.mxu0 %v717_v49  ;;  %4148 = vmatprep.subr.bf16.mxu0 %v4569_v42  ;;  %v4573_v47 = vld [vmem:[#allocation9 + $0xc8] sm:$0xff]  }
 0x137   : > { %v592_v54 = vmul.f32 0.2, %v525_v53  ;;  %v719_v55 = vpack.c.bf16 %v621_v50, %v619_v43  ;;  %v626_v57 = vmax.f32 %v4428_v48, %v594_v51  ;;  %v721_v1 = vpack.c.bf16 %v623_v59, %v621_v50  ;;  %v4571_v43 = vld [vmem:[#allocation9 + $0x48] sm:$0xff]   ;;  %4149 = vmatpush3.bf16.msra.mxu0 %v4570_v45  ;;  %v4576_v48 = vld [vmem:[#allocation9] sm:$0xff]  }
 0x138   : > { %v4429_v56 = vpop.f32.mrf.mxu0  ;;  %4150 = vmatprep.subr.bf16.mxu0 %v4573_v47  ;;  %v4574_v49 = vld [vmem:[#allocation9 + $0x88] sm:$0xff]   ;;  %v4577_v50 = vld [vmem:[#allocation9 + $0xc0] sm:$0xff]  }
 0x139   : > { %v624_v58 = vmax.f32 %v525_v53, %v592_v54  ;;  %1056 = vmatmul.mubr.bf16.gmra.mxu1 %v719_v55  ;;  %v595_v4 = vmul.f32 0.2, %v4429_v56  ;;  %v4578_v51 = vld [vmem:[#allocation9 + $0x80] sm:$0xff]   ;;  %v4581_v53 = vld [vmem:[#allocation9 + $0x1f8] sm:$0xff]  }
 0x13a   : > { %v528_v60 = vpop.f32.mrf.mxu0 }
 0x13b   : > { %v722_v61 = vpack.c.bf16 %v624_v58, %v622_v41  ;;  %v724_v62 = vpack.c.bf16 %v626_v57, %v624_v58  ;;  %v593_v63 = vmul.f32 0.2, %v528_v60  ;;  %v627_v11 = vmax.f32 %v4429_v56, %v595_v4  ;;  %v4568_v41 = vld [vmem:[#allocation9 + $0x10] sm:$0xff]   ;;  %4151 = vmatpush3.bf16.msra.mxu0 %v4574_v49 }
 0x13c   : > { %v4432_v0 = vpop.f32.mrf.mxu0  ;;  %4097 = vmatpush3.bf16.msra.mxu1 %v4568_v41  ;;  %4152 = vmatprep.subr.bf16.mxu0 %v4577_v50  ;;  %v4587_v41 = vld [vmem:[#allocation9 + $0x168] sm:$0xff]   ;;  %v4582_v50 = vld [vmem:[#allocation9 + $0x1b8] sm:$0xff]  }
 0x13d   : > { %v625_v2 = vmax.f32 %v528_v60, %v593_v63  ;;  %v598_v3 = vmul.f32 0.2, %v4432_v0  ;;  %1063 = vmatprep.mubr.bf16.mxu1 %v724_v62  ;;  %1152 = vmatprep.mubr.bf16.mxu0 %v722_v61 }
 0x13e   : > { %v541_v5 = vpop.f32.mrf.mxu0  ;;  %1153 = vmatmul.mubr.bf16.gmra.mxu0 %v721_v1  ;;  %4098 = vmatprep.subr.bf16.mxu1 %v4571_v43 }
 0x13f   : > { %v723_v6 = vpack.c.bf16 %v625_v2, %v623_v59  ;;  %v596_v7 = vmul.f32 0.2, %v541_v5  ;;  %v630_v9 = vmax.f32 %v4432_v0, %v598_v3  ;;  %v725_v16 = vpack.c.bf16 %v627_v11, %v625_v2  ;;  %4153 = vmatpush3.bf16.msra.mxu0 %v4578_v51  ;;  %v4588_v51 = vld [vmem:[#allocation9 + $0x128] sm:$0xff]  }
 0x140   : > { %v4433_v8 = vpop.f32.mrf.mxu0  ;;  %4099 = vmatpush3.bf16.msra.mxu1 %v4572_v44  ;;  %4242 = vmatprep.subr.bf16.mxu0 %v4581_v53 }
 0x141   : > { %v628_v10 = vmax.f32 %v541_v5, %v596_v7  ;;  %1064 = vmatmul.mubr.bf16.gmra.mxu1 %v723_v6  ;;  %v599_v20 = vmul.f32 0.2, %v4433_v8  ;;  %4100 = vmatprep.subr.bf16.mxu1 %v4575_v46 }
 0x142   : > { %v544_v12 = vpop.f32.mrf.mxu0 }
 0x143   : > { %v726_v13 = vpack.c.bf16 %v628_v10, %v626_v57  ;;  %v728_v14 = vpack.c.bf16 %v630_v9, %v628_v10  ;;  %v597_v15 = vmul.f32 0.2, %v544_v12  ;;  %v631_v27 = vmax.f32 %v4433_v8, %v599_v20 }
 0x144   : > { %v4436_v17 = vpop.f32.mrf.mxu0  ;;  %4101 = vmatpush3.bf16.msra.mxu1 %v4576_v48 }
 0x145   : > { %v629_v18 = vmax.f32 %v544_v12, %v597_v15  ;;  %v602_v19 = vmul.f32 0.2, %v4436_v17  ;;  %1071 = vmatprep.mubr.bf16.mxu1 %v728_v14  ;;  %1160 = vmatprep.mubr.bf16.mxu0 %v726_v13 }
 0x146   : > { %v557_v21 = vpop.f32.mrf.mxu0  ;;  %1161 = vmatmul.mubr.bf16.gmra.mxu0 %v725_v16  ;;  %4190 = vmatprep.subr.bf16.mxu1 %v4579_v52 }
 0x147   : > { %v727_v22 = vpack.c.bf16 %v629_v18, %v627_v11  ;;  %v634_v23 = vmax.f32 %v4436_v17, %v602_v19  ;;  %v600_v24 = vmul.f32 0.2, %v557_v21  ;;  %v729_v32 = vpack.c.bf16 %v631_v27, %v629_v18 }
 0x148   : > { %v4437_v25 = vpop.f32.mrf.mxu0 }
 0x149   : > { %v632_v26 = vmax.f32 %v557_v21, %v600_v24  ;;  %1072 = vmatmul.mubr.bf16.gmra.mxu1 %v727_v22  ;;  %v734_v33 = vpack.c.bf16 %v5562_v36, %v634_v23  ;;  %v603_v35 = vmul.f32 0.2, %v4437_v25 }
 0x14a   : > { %v560_v28 = vpop.f32.mrf.mxu0 }
 0x14b   : > { %v730_v29 = vpack.c.bf16 %v632_v26, %v630_v9  ;;  %v732_v30 = vpack.c.bf16 %v634_v23, %v632_v26  ;;  %v601_v31 = vmul.f32 0.2, %v560_v28  ;;  %v635_v38 = vmax.f32 %v4437_v25, %v603_v35  ;;  %v4580_v25 = vld [vmem:[#allocation9 + $0x138] sm:$0xff]  }
 0x14d   : > { %v633_v34 = vmax.f32 %v560_v28, %v601_v31  ;;  %1079 = vmatprep.mubr.bf16.mxu1 %v732_v30  ;;  %1168 = vmatprep.mubr.bf16.mxu0 %v730_v29  ;;  %v4583_v29 = vld [vmem:[#allocation9 + $0x170] sm:$0xff]  }
 0x14e   : > { %1169 = vmatmul.mubr.bf16.gmra.mxu0 %v729_v32 }
 0x14f   : > { %v731_v37 = vpack.c.bf16 %v633_v34, %v631_v27  ;;  %1176 = vmatprep.mubr.bf16.mxu0 %v734_v33  ;;  %v733_v39 = vpack.c.bf16 %v635_v38, %v633_v34  ;;  %v4584_v38 = vld [vmem:[#allocation9 + $0x130] sm:$0xff]  }
 0x151   : > { %1080 = vmatmul.mubr.bf16.gmra.mxu1 %v731_v37 }
 0x156   : > { %1177 = vmatmul.mubr.bf16.gmra.mxu0 %v733_v39 }
 0x1d9   : > { %v3974_v54 = vpop.f32.mrf.mxu1 }
 0x1db   : > { %v3975_v55 = vpop.f32.mrf.mxu1 }
 0x1dc   : > { %v3976_v60 = vadd.f32 %v3975_v55, %v3974_v54  ;;  %v4585_v55 = vld [vmem:[#allocation9 + $0x1f0] sm:$0xff]  }
 0x1dd   : > { %v3977_v56 = vpop.f32.mrf.mxu1 }
 0x1de   : > { %v4038_v57 = vpop.f32.mrf.mxu0 }
 0x1df   : > { %v3978_v58 = vpop.f32.mrf.mxu1 }
 0x1e0   : > { %v4039_v59 = vpop.f32.mrf.mxu0  ;;  %v3979_v3 = vadd.f32 %v3978_v58, %v3977_v56  ;;  %v4591_v56 = vld [vmem:[#allocation9 + $0x160] sm:$0xff]  }
 0x1e1   : > { %v4040_v61 = vadd.f32 %v4039_v59, %v4038_v57  ;;  %v3980_v62 = vpop.f32.mrf.mxu1 }
 0x1e2   : > { %v4041_v63 = vpop.f32.mrf.mxu0 }
 0x1e3   : > { %v1123_v0 = vadd.f32 %v4040_v61, %v3976_v60  ;;  %v3981_v1 = vpop.f32.mrf.mxu1 }
 0x1e4   : > { %v4042_v2 = vpop.f32.mrf.mxu0  ;;  %v3982_v11 = vadd.f32 %v3981_v1, %v3980_v62  ;;  %v4592_v1 = vld [vmem:[#allocation9 + $0x120] sm:$0xff]  }
 0x1e5   : > { %v4043_v4 = vadd.f32 %v4042_v2, %v4041_v63  ;;  %v3983_v5 = vpop.f32.mrf.mxu1  ;;  %v1185_v6 = vmul.f32 0.2, %v1123_v0 }
 0x1e6   : > { %v4044_v7 = vpop.f32.mrf.mxu0 }
 0x1e7   : > { %v1126_v8 = vadd.f32 %v4043_v4, %v3979_v3  ;;  %v3984_v9 = vpop.f32.mrf.mxu1  ;;  %v1201_v15 = vmax.f32 %v1123_v0, %v1185_v6  ;;  %v4586_v0 = vld [vmem:[#allocation9 + $0x1b0] sm:$0xff]   ;;  %v4589_v4 = vld [vmem:[#allocation9 + $0x1e8] sm:$0xff]  }
 0x1e8   : > { %v4045_v10 = vpop.f32.mrf.mxu0  ;;  %v3985_v21 = vadd.f32 %v3984_v9, %v3983_v5  ;;  %v4595_v5 = vld [vmem:[#allocation9 + $0x158] sm:$0xff]  }
 0x1e9   : > { %v1186_v12 = vmul.f32 0.2, %v1126_v8  ;;  %v4046_v13 = vadd.f32 %v4045_v10, %v4044_v7  ;;  %v3986_v14 = vpop.f32.mrf.mxu1  ;;  %v1252_v26 = vpack.c.bf16 %v1201_v15, %v5562_v36 }
 0x1ea   : > { %v4047_v16 = vpop.f32.mrf.mxu0 }
 0x1eb   : > { %v1202_v17 = vmax.f32 %v1126_v8, %v1186_v12  ;;  %v1131_v18 = vadd.f32 %v4046_v13, %v3982_v11  ;;  %v3987_v19 = vpop.f32.mrf.mxu1 }
 0x1ec   : > { %v4048_v20 = vpop.f32.mrf.mxu0  ;;  %v3988_v33 = vadd.f32 %v3987_v19, %v3986_v14  ;;  %v4590_v14 = vld [vmem:[#allocation9 + $0x1a8] sm:$0xff]   ;;  %v4593_v19 = vld [vmem:[#allocation9 + $0x1e0] sm:$0xff]  }
 0x1ed   : > { %v4049_v22 = vadd.f32 %v4048_v20, %v4047_v16  ;;  %v3989_v23 = vpop.f32.mrf.mxu1  ;;  %v1253_v24 = vpack.c.bf16 %v1202_v17, %v1201_v15  ;;  %v1187_v27 = vmul.f32 0.2, %v1131_v18  ;;  %v4596_v15 = vld [vmem:[#allocation9 + $0x118] sm:$0xff]   ;;  %v4599_v20 = vld [vmem:[#allocation9 + $0x150] sm:$0xff]  }
 0x1ee   : > { %v4050_v28 = vpop.f32.mrf.mxu0 }
 0x1ef   : > { %v1134_v30 = vadd.f32 %v4049_v22, %v3985_v21  ;;  %v3990_v31 = vpop.f32.mrf.mxu1  ;;  %1820 = vmatprep.mubr.bf16.mxu1 %v1253_v24  ;;  %v1203_v39 = vmax.f32 %v1131_v18, %v1187_v27 }
 0x1f0   : > { %v4051_v32 = vpop.f32.mrf.mxu0  ;;  %1821 = vmatmul.mubr.bf16.vlgmr.msra.gmra.mxu1 %v1252_v26  ;;  %v3991_v46 = vadd.f32 %v3990_v31, %v3989_v23 }
 0x1f1   : > { %v1188_v34 = vmul.f32 0.2, %v1134_v30  ;;  %v4052_v35 = vadd.f32 %v4051_v32, %v4050_v28  ;;  %v3992_v37 = vpop.f32.mrf.mxu1  ;;  %4191 = vmatpush3.bf16.msra.mxu1 %v4580_v25  ;;  %v1254_v54 = vpack.c.bf16 %v1203_v39, %v1202_v17  ;;  %v4594_v28 = vld [vmem:[#allocation9 + $0x1a0] sm:$0xff]   ;;  %v4597_v32 = vld [vmem:[#allocation9 + $0x1d8] sm:$0xff]  }
 0x1f2   : > { %v4053_v40 = vpop.f32.mrf.mxu0  ;;  %4192 = vmatprep.subr.bf16.mxu1 %v4583_v29  ;;  %v4600_v29 = vld [vmem:[#allocation9 + $0x110] sm:$0xff]  }
 0x1f3   : > { %v1204_v42 = vmax.f32 %v1134_v30, %v1188_v34  ;;  %v1139_v43 = vadd.f32 %v4052_v35, %v3988_v33  ;;  %v3993_v44 = vpop.f32.mrf.mxu1  ;;  %v4603_v33 = vld [vmem:[#allocation9 + $0x148] sm:$0xff]  }
 0x1f4   : > { %v4054_v45 = vpop.f32.mrf.mxu0  ;;  %v3994_v60 = vadd.f32 %v3993_v44, %v3992_v37  ;;  %v4604_v44 = vld [vmem:[#allocation9 + $0x108] sm:$0xff]  }
 0x1f5   : > { %v4055_v47 = vadd.f32 %v4054_v45, %v4053_v40  ;;  %v3995_v48 = vpop.f32.mrf.mxu1  ;;  %v1255_v49 = vpack.c.bf16 %v1204_v42, %v1203_v39  ;;  %4193 = vmatpush3.bf16.msra.mxu1 %v4584_v38  ;;  %v1189_v52 = vmul.f32 0.2, %v1139_v43 }
 0x1f6   : > { %v4056_v53 = vpop.f32.mrf.mxu0  ;;  %4194 = vmatprep.subr.bf16.mxu1 %v4587_v41 }
 0x1f7   : > { %v1142_v57 = vadd.f32 %v4055_v47, %v3991_v46  ;;  %v3996_v58 = vpop.f32.mrf.mxu1  ;;  %1828 = vmatprep.mubr.bf16.mxu1 %v1255_v49  ;;  %1900 = vmatprep.mubr.bf16.mxu0 %v1255_v49  ;;  %v1205_v2 = vmax.f32 %v1139_v43, %v1189_v52  ;;  %v4598_v43 = vld [vmem:[#allocation9 + $0x198] sm:$0xff]   ;;  %v4606_v49 = vld [vmem:[#allocation9 + $0x140] sm:$0xff]  }
 0x1f8   : > { %v4057_v59 = vpop.f32.mrf.mxu0  ;;  %1829 = vmatmul.mubr.bf16.gmra.mxu1 %v1254_v54  ;;  %1901 = vmatmul.mubr.bf16.vlgmr.msra.gmra.mxu0 %v1254_v54  ;;  %v3997_v10 = vadd.f32 %v3996_v58, %v3995_v48  ;;  %v4601_v48 = vld [vmem:[#allocation9 + $0x1d0] sm:$0xff]  }
 0x1f9   : > { %v1190_v61 = vmul.f32 0.2, %v1142_v57  ;;  %v4058_v62 = vadd.f32 %v4057_v59, %v4056_v53  ;;  %4243 = vmatpush3.bf16.msra.mxu0 %v4582_v50  ;;  %v3998_v63 = vpop.f32.mrf.mxu1  ;;  %4195 = vmatpush3.bf16.msra.mxu1 %v4588_v51  ;;  %v5139_v18 = vpack.c.bf16 %v1205_v2, %v1204_v42 }
 0x1fa   : > { %v4059_v3 = vpop.f32.mrf.mxu0  ;;  %4244 = vmatprep.subr.bf16.mxu0 %v4585_v55  ;;  %4196 = vmatprep.subr.bf16.mxu1 %v4591_v56  ;;  %v4602_v56 = vld [vmem:[#allocation9 + $0x190] sm:$0xff]  }
 0x1fb   : > { %v1206_v6 = vmax.f32 %v1142_v57, %v1190_v61  ;;  %v1147_v7 = vadd.f32 %v4058_v62, %v3994_v60  ;;  %v3999_v8 = vpop.f32.mrf.mxu1  ;;  %v4608_v57 = vld [vmem:[#allocation9 + $0x100] sm:$0xff]   ;;  %v4605_v61 = vld [vmem:[#allocation9 + $0x1c8] sm:$0xff]  }
 0x1fc   : > { %v4060_v9 = vpop.f32.mrf.mxu0  ;;  %v4000_v24 = vadd.f32 %v3999_v8, %v3998_v63 }
 0x1fd   : > { %v4061_v11 = vadd.f32 %v4060_v9, %v4059_v3  ;;  %v4001_v12 = vpop.f32.mrf.mxu1  ;;  %4245 = vmatpush3.bf16.msra.mxu0 %v4586_v0  ;;  %v5137_v13 = vpack.c.bf16 %v1206_v6, %v1205_v2  ;;  %4197 = vmatpush3.bf16.msra.mxu1 %v4592_v1  ;;  %v1191_v16 = vmul.f32 0.2, %v1147_v7  ;;  %v4609_v9 = vld [vmem:[#allocation9 + $0x1c0] sm:$0xff]  }
 0x1fe   : > { %v4062_v17 = vpop.f32.mrf.mxu0  ;;  %4246 = vmatprep.subr.bf16.mxu0 %v4589_v4  ;;  %4198 = vmatprep.subr.bf16.mxu1 %v4595_v5  ;;  %v4607_v5 = vld [vmem:[#allocation9 + $0x188] sm:$0xff]  }
 0x1ff   : > { %v1150_v21 = vadd.f32 %v4061_v11, %v3997_v10  ;;  %v4002_v22 = vpop.f32.mrf.mxu1  ;;  %1836 = vmatprep.mubr.bf16.mxu1 %v5137_v13  ;;  %1908 = vmatprep.mubr.bf16.mxu0 %v5137_v13  ;;  %v1207_v30 = vmax.f32 %v1147_v7, %v1191_v16 }
 0x200   : > { %v4063_v23 = vpop.f32.mrf.mxu0  ;;  %1837 = vmatmul.mubr.bf16.gmra.mxu1 %v5139_v18  ;;  %1909 = vmatmul.mubr.bf16.gmra.mxu0 %v5139_v18  ;;  %v4003_v40 = vadd.f32 %v4002_v22, %v4001_v12 }
 0x201   : > { %v1192_v25 = vmul.f32 0.2, %v1150_v21  ;;  %v4064_v26 = vadd.f32 %v4063_v23, %v4062_v17  ;;  %v4004_v27 = vpop.f32.mrf.mxu1  ;;  %4247 = vmatpush3.bf16.msra.mxu0 %v4590_v14  ;;  %4199 = vmatpush3.bf16.msra.mxu1 %v4596_v15  ;;  %v5147_v45 = vpack.c.bf16 %v1207_v30, %v1206_v6 }
 0x202   : > { %v4065_v31 = vpop.f32.mrf.mxu0  ;;  %4248 = vmatprep.subr.bf16.mxu0 %v4593_v19  ;;  %4200 = vmatprep.subr.bf16.mxu1 %v4599_v20  ;;  %v4610_v19 = vld [vmem:[#allocation9 + $0x180] sm:$0xff]  }
 0x203   : > { %v1208_v34 = vmax.f32 %v1150_v21, %v1192_v25  ;;  %v1155_v35 = vadd.f32 %v4064_v26, %v4000_v24  ;;  %v4005_v37 = vpop.f32.mrf.mxu1 }
 0x204   : > { %v4066_v38 = vpop.f32.mrf.mxu0  ;;  %v4006_v53 = vadd.f32 %v4005_v37, %v4004_v27 }
 0x205   : > { %v5145_v39 = vpack.c.bf16 %v1208_v34, %v1207_v30  ;;  %v4067_v41 = vadd.f32 %v4066_v38, %v4065_v31  ;;  %v4007_v42 = vpop.f32.mrf.mxu1  ;;  %4249 = vmatpush3.bf16.msra.mxu0 %v4594_v28  ;;  %4201 = vmatpush3.bf16.msra.mxu1 %v4600_v29  ;;  %v1193_v46 = vmul.f32 0.2, %v1155_v35 }
 0x206   : > { %v4068_v47 = vpop.f32.mrf.mxu0  ;;  %4250 = vmatprep.subr.bf16.mxu0 %v4597_v32  ;;  %4202 = vmatprep.subr.bf16.mxu1 %v4603_v33 }
 0x207   : > { %v1158_v50 = vadd.f32 %v4067_v41, %v4003_v40  ;;  %v4008_v51 = vpop.f32.mrf.mxu1  ;;  %1844 = vmatprep.mubr.bf16.mxu1 %v5145_v39  ;;  %1916 = vmatprep.mubr.bf16.mxu0 %v5145_v39  ;;  %v1209_v58 = vmax.f32 %v1155_v35, %v1193_v46 }
 0x208   : > { %v4069_v52 = vpop.f32.mrf.mxu0  ;;  %1845 = vmatmul.mubr.bf16.gmra.mxu1 %v5147_v45  ;;  %1917 = vmatmul.mubr.bf16.gmra.mxu0 %v5147_v45  ;;  %v4009_v1 = vadd.f32 %v4008_v51, %v4007_v42 }
 0x209   : > { %v1194_v54 = vmul.f32 0.2, %v1158_v50  ;;  %v4070_v55 = vadd.f32 %v4069_v52, %v4068_v47  ;;  %4251 = vmatpush3.bf16.msra.mxu0 %v4598_v43  ;;  %4203 = vmatpush3.bf16.msra.mxu1 %v4604_v44  ;;  %v4010_v59 = vpop.f32.mrf.mxu1  ;;  %v1260_v6 = vpack.c.bf16 %v1209_v58, %v1208_v34 }
 0x20a   : > { %v4071_v60 = vpop.f32.mrf.mxu0  ;;  %4252 = vmatprep.subr.bf16.mxu0 %v4601_v48  ;;  %4204 = vmatprep.subr.bf16.mxu1 %v4606_v49 }
 0x20b   : > { %v1210_v62 = vmax.f32 %v1158_v50, %v1194_v54  ;;  %v1163_v63 = vadd.f32 %v4070_v55, %v4006_v53  ;;  %v4011_v7 = vpop.f32.mrf.mxu1 }
 0x20c   : > { %v4072_v0 = vpop.f32.mrf.mxu0  ;;  %v4012_v14 = vadd.f32 %v4011_v7, %v4010_v59  ;;  %v4943_v7 = vmov 0.0|0.0  }
 0x20d   : > { %v1195_v2 = vmul.f32 0.2, %v1163_v63  ;;  %v4073_v3 = vadd.f32 %v4072_v0, %v4071_v60  ;;  %v1261_v4 = vpack.c.bf16 %v1210_v62, %v1209_v58  ;;  %4253 = vmatpush3.bf16.msra.mxu0 %v4602_v56  ;;  %4205 = vmatpush3.bf16.msra.mxu1 %v4608_v57  ;;  %v1268_v24 = vpack.c.bf16 %v1210_v62, %v1210_v62  ;;  %v4013_v29 = vpop.f32.mrf.mxu1  ;;  %v4613_v56 = vld [vmem:[#allocation11 + $0x74] ss:$8 sps:$4 sm:$0xff]   ;;  %v4611_v57 = vld [vmem:[#allocation11 + $0x70] ss:$8 sps:$4 sm:$0xff]  }
 0x20e   : > { %v4074_v8 = vpop.f32.mrf.mxu0  ;;  %4254 = vmatprep.subr.bf16.mxu0 %v4605_v61  ;;  %2550 = vmatprep.subr.bf16.mxu1 %v4613_v56  ;;  %v4616_v61 = vld [vmem:[#allocation11 + $0x64] ss:$8 sps:$4 sm:$0xff]   ;;  %v4622_v0 = vld [vmem:[#allocation11 + $0x174] ss:$8 sps:$4 sm:$0xff]  }
 0x20f   : > { %v1211_v10 = vmax.f32 %v1163_v63, %v1195_v2  ;;  %v1166_v11 = vadd.f32 %v4073_v3, %v4009_v1  ;;  %1852 = vmatprep.mubr.bf16.mxu1 %v1261_v4  ;;  %1924 = vmatprep.mubr.bf16.mxu0 %v1261_v4  ;;  %v4014_v31 = vpop.f32.mrf.mxu1  ;;  %v4619_v63 = vld [vmem:[#allocation11 + $0x54] ss:$8 sps:$4 sm:$0xff]   ;;  %v4617_v1 = vld [vmem:[#allocation11 + $0x50] ss:$8 sps:$4 sm:$0xff]   ;;  %v4697_v56 = vld [vmem:[#allocation11 + $0x84] ss:$8 sps:$4 sm:$0xff]  }
 0x210   : > { %v4075_v12 = vpop.f32.mrf.mxu0  ;;  %1853 = vmatmul.mubr.bf16.gmra.mxu1 %v1260_v6  ;;  %1925 = vmatmul.mubr.bf16.gmra.mxu0 %v1260_v6  ;;  %v4620_v2 = vld [vmem:[#allocation11 + $0x170] ss:$8 sps:$4 sm:$0xff]  }
 0x211   : > { %v1196_v15 = vmul.f32 0.2, %v1166_v11  ;;  %v4076_v16 = vadd.f32 %v4075_v12, %v4074_v8  ;;  %v1269_v17 = vpack.c.bf16 %v1211_v10, %v1211_v10  ;;  %4255 = vmatpush3.bf16.msra.mxu0 %v4607_v5  ;;  %v1262_v25 = vpack.c.bf16 %v1211_v10, %v1210_v62  ;;  %v4016_v34 = vpop.f32.mrf.mxu1  ;;  %v4614_v62 = vld [vmem:[#allocation11 + $0x60] ss:$8 sps:$4 sm:$0xff]   ;;  %v4625_v5 = vld [vmem:[#allocation11 + $0x44] ss:$8 sps:$4 sm:$0xff]  }
 0x212   : > { %4256 = vmatprep.subr.bf16.mxu0 %v4609_v9  ;;  %v4077_v27 = vpop.f32.mrf.mxu0  ;;  %v4623_v8 = vld [vmem:[#allocation11 + $0x40] ss:$8 sps:$4 sm:$0xff]   ;;  %v4629_v12 = vld [vmem:[#allocation11 + $0x30] ss:$8 sps:$4 sm:$0xff]  }
 0x213   : > { %v1212_v20 = vmax.f32 %v1166_v11, %v1196_v15  ;;  %v1171_v21 = vadd.f32 %v4076_v16, %v4012_v14  ;;  %1860 = vmatprep.mubr.bf16.mxu1 %v1269_v17  ;;  %v4017_v37 = vpop.f32.mrf.mxu1  ;;  %v4626_v9 = vld [vmem:[#allocation11 + $0x160] ss:$8 sps:$4 sm:$0xff]   ;;  %v4634_v11 = vld [vmem:[#allocation11 + $0x154] ss:$8 sps:$4 sm:$0xff]   ;;  %v4632_v14 = vld [vmem:[#allocation11 + $0x150] ss:$8 sps:$4 sm:$0xff]  }
 0x214   : > { %v4078_v30 = vpop.f32.mrf.mxu0  ;;  %v4637_v16 = vld [vmem:[#allocation11 + $0x24] ss:$8 sps:$4 sm:$0xff]  }
 0x215   : > { %v1197_v22 = vmul.f32 0.2, %v1171_v21  ;;  %v1263_v23 = vpack.c.bf16 %v1212_v20, %v1211_v10  ;;  %4257 = vmatpush3.bf16.msra.mxu0 %v4610_v19  ;;  %v1270_v32 = vpack.c.bf16 %v1212_v20, %v1212_v20  ;;  %v4079_v38 = vadd.f32 %v4078_v30, %v4077_v27  ;;  %v4019_v41 = vpop.f32.mrf.mxu1  ;;  %v4631_v10 = vld [vmem:[#allocation11 + $0x34] ss:$8 sps:$4 sm:$0xff]   ;;  %v4640_v17 = vld [vmem:[#allocation11 + $0x144] ss:$8 sps:$4 sm:$0xff]  }
 0x216   : > { %v4080_v33 = vpop.f32.mrf.mxu0  ;;  %2611 = vmatprep.subr.bf16.mxu0 %v4622_v0  ;;  %v4635_v19 = vld [vmem:[#allocation11 + $0x20] ss:$8 sps:$4 sm:$0xff]   ;;  %v4658_v30 = vld [vmem:[#allocation11 + $0x114] ss:$8 sps:$4 sm:$0xff]  }
 0x217   : > { %v1213_v26 = vmax.f32 %v1171_v21, %v1197_v22  ;;  %1932 = vmatprep.mubr.bf16.mxu0 %v1263_v23  ;;  %v4643_v21 = vld [vmem:[#allocation11 + $0x14] ss:$8 sps:$4 sm:$0xff]   ;;  %v4647_v27 = vld [vmem:[#allocation11] ss:$8 sps:$4 sm:$0xff]  }
 0x218   : > { %1861 = vmatmul.mubr.bf16.gmra.mxu1 %v1268_v24  ;;  %1933 = vmatmul.mubr.bf16.gmra.mxu0 %v1262_v25  ;;  %v4081_v35 = vpop.f32.mrf.mxu0  ;;  %v4646_v22 = vld [vmem:[#allocation11 + $0x134] ss:$8 sps:$4 sm:$0xff]   ;;  %v4644_v24 = vld [vmem:[#allocation11 + $0x130] ss:$8 sps:$4 sm:$0xff]  }
 0x219   : > { %1980 = vmatprep.mubr.bf16.mxu1 %v5137_v13  ;;  %v1271_v28 = vpack.c.bf16 %v1213_v26, %v1213_v26  ;;  %v4015_v13 = vadd.f32 %v4014_v31, %v4013_v29  ;;  %v4082_v46 = vadd.f32 %v4081_v35, %v4080_v33  ;;  %v1264_v58 = vpack.c.bf16 %v1213_v26, %v1212_v20  ;;  %v4638_v20 = vld [vmem:[#allocation11 + $0x140] ss:$8 sps:$4 sm:$0xff]   ;;  %v4655_v29 = vld [vmem:[#allocation11 + $0xf4] ss:$8 sps:$4 sm:$0xff]   ;;  %v4653_v31 = vld [vmem:[#allocation11 + $0xf0] ss:$8 sps:$4 sm:$0xff]  }
 0x21a   : > { %v4083_v40 = vpop.f32.mrf.mxu0  ;;  %v4661_v33 = vld [vmem:[#allocation11 + $0xe4] ss:$8 sps:$4 sm:$0xff]   ;;  %v4659_v35 = vld [vmem:[#allocation11 + $0xe0] ss:$8 sps:$4 sm:$0xff]   ;;  %v4707_v0 = vld [vmem:[%s5558_s5 + $0x78] sm:$0xff]  }
 0x21b   : > { %1940 = vmatprep.mubr.bf16.mxu0 %v1271_v28  ;;  %v1174_v42 = vadd.f32 %v4079_v38, %v4015_v13  ;;  %v4650_v28 = vld [vmem:[#allocation11 + $0x120] ss:$8 sps:$4 sm:$0xff]   ;;  %v4667_v38 = vld [vmem:[#allocation11 + $0xd4] ss:$8 sps:$4 sm:$0xff]   ;;  %v4665_v13 = vld [vmem:[#allocation11 + $0xd0] ss:$8 sps:$4 sm:$0xff]  }
 0x21c   : > { %v4084_v43 = vpop.f32.mrf.mxu0 }
 0x21d   : > { %v1198_v44 = vmul.f32 0.2, %v1174_v42  ;;  %v4085_v47 = vadd.f32 %v4084_v43, %v4083_v40  ;;  %v4670_v40 = vld [vmem:[#allocation11 + $0x1f4] ss:$8 sps:$4 sm:$0xff]   ;;  %v4676_v43 = vld [vmem:[#allocation11 + $0x1e4] ss:$8 sps:$4 sm:$0xff]  }
 0x21f   : > { %v1214_v49 = vmax.f32 %v1174_v42, %v1198_v44  ;;  %v4673_v42 = vld [vmem:[#allocation11 + $0xc4] ss:$8 sps:$4 sm:$0xff]   ;;  %v4674_v44 = vld [vmem:[#allocation11 + $0x1e0] ss:$8 sps:$4 sm:$0xff]  }
 0x220   : > { %1941 = vmatmul.mubr.bf16.gmra.mxu0 %v1270_v32  ;;  %1981 = vmatmul.mubr.bf16.vlgmr.msra.gmra.mxu1 %v5139_v18  ;;  %v4020_v18 = vpop.f32.mrf.mxu1  ;;  %v4656_v32 = vld [vmem:[#allocation11 + $0x110] ss:$8 sps:$4 sm:$0xff]  }
 0x221   : > { %1988 = vmatprep.mubr.bf16.mxu1 %v5145_v39  ;;  %2060 = vmatprep.mubr.bf16.mxu0 %v5145_v39  ;;  %v4018_v39 = vadd.f32 %v4017_v37, %v4016_v34  ;;  %v4021_v48 = vadd.f32 %v4020_v18, %v4019_v41  ;;  %v1265_v53 = vpack.c.bf16 %v1214_v49, %v1213_v26  ;;  %v4652_v26 = vld [vmem:[#allocation11 + $0x124] ss:$8 sps:$4 sm:$0xff]   ;;  %v4662_v37 = vld [vmem:[#allocation11 + $0x100] ss:$8 sps:$4 sm:$0xff]   ;;  %v4668_v41 = vld [vmem:[#allocation11 + $0x1f0] ss:$8 sps:$4 sm:$0xff]  }
 0x222   : > { %2551 = vmatpush1.bf16.msra.mxu1 %v4611_v57  ;;  %v1272_v3 = vpack.c.bf16 %v1214_v49, %v1214_v49  ;;  %v4664_v34 = vld [vmem:[#allocation11 + $0x104] ss:$8 sps:$4 sm:$0xff]   ;;  %v4671_v18 = vld [vmem:[#allocation11 + $0xc0] ss:$8 sps:$4 sm:$0xff]  }
 0x223   : > { %v1179_v50 = vadd.f32 %v4082_v46, %v4018_v39  ;;  %v1182_v51 = vadd.f32 %v4085_v47, %v4021_v48  ;;  %2552 = vmatprep.subr.bf16.mxu1 %v4616_v61  ;;  %v4679_v46 = vld [vmem:[#allocation11 + $0xb4] ss:$8 sps:$4 sm:$0xff]   ;;  %v4677_v39 = vld [vmem:[#allocation11 + $0xb0] ss:$8 sps:$4 sm:$0xff]   ;;  %v4700_v57 = vld [vmem:[#allocation11 + $0x1a4] ss:$8 sps:$4 sm:$0xff]  }
 0x224   : > { %v4682_v47 = vld [vmem:[#allocation11 + $0x1d4] ss:$8 sps:$4 sm:$0xff]   ;;  %v4680_v48 = vld [vmem:[#allocation11 + $0x1d0] ss:$8 sps:$4 sm:$0xff]  }
 0x225   : > { %v1200_v52 = vmul.f32 0.2, %v1182_v51  ;;  %v4701_v61 = vld [vmem:[#allocation11 + $0x190] ss:$8 sps:$4 sm:$0xff]  }
 0x226   : > { %2553 = vmatpush1.bf16.msra.mxu1 %v4614_v62  ;;  %v4706_v62 = vld [vmem:[#allocation11 + $0x184] ss:$8 sps:$4 sm:$0xff]  }
 0x227   : > { %v1216_v55 = vmax.f32 %v1182_v51, %v1200_v52  ;;  %2554 = vmatprep.subr.bf16.mxu1 %v4619_v63  ;;  %v4683_v51 = vld [vmem:[#allocation11 + $0xa0] ss:$8 sps:$4 sm:$0xff]   ;;  %v4691_v52 = vld [vmem:[#allocation11 + $0x94] ss:$8 sps:$4 sm:$0xff]  }
 0x228   : > { %1989 = vmatmul.mubr.bf16.gmra.mxu1 %v5147_v45  ;;  %2061 = vmatmul.mubr.bf16.vlgmr.msra.gmra.mxu0 %v5147_v45  ;;  %v1199_v45 = vmul.f32 0.2, %v1179_v50  ;;  %v4704_v63 = vld [vmem:[#allocation11 + $0x180] ss:$8 sps:$4 sm:$0xff]  }
 0x229   : > { %1996 = vmatprep.mubr.bf16.mxu1 %v1261_v4  ;;  %2068 = vmatprep.mubr.bf16.mxu0 %v1261_v4  ;;  %v1274_v15 = vpack.c.bf16 %v1216_v55, %v1216_v55 }
 0x22a   : > { %v1215_v54 = vmax.f32 %v1179_v50, %v1199_v45  ;;  %2555 = vmatpush1.bf16.msra.mxu1 %v4617_v1  ;;  %2612 = vmatpush1.bf16.msra.mxu0 %v4620_v2  ;;  %v4688_v50 = vld [vmem:[#allocation11 + $0x1c4] ss:$8 sps:$4 sm:$0xff]   ;;  %v4686_v45 = vld [vmem:[#allocation11 + $0x1c0] ss:$8 sps:$4 sm:$0xff]  }
 0x22b   : > { %2556 = vmatprep.subr.bf16.mxu1 %v4625_v5 }
 0x22c   : > { %v1273_v59 = vpack.c.bf16 %v1215_v54, %v1215_v54  ;;  %v1267_v60 = vpack.c.bf16 %v1216_v55, %v1215_v54  ;;  %v1266_v4 = vpack.c.bf16 %v1215_v54, %v1214_v49  ;;  %v4685_v49 = vld [vmem:[#allocation11 + $0xa4] ss:$8 sps:$4 sm:$0xff]   ;;  %v4689_v54 = vld [vmem:[#allocation11 + $0x90] ss:$8 sps:$4 sm:$0xff]  }
 0x22d   : > { %v4692_v55 = vld [vmem:[#allocation11 + $0x1b0] ss:$8 sps:$4 sm:$0xff]  }
 0x22e   : > { %2557 = vmatpush1.bf16.msra.mxu1 %v4623_v8 }
 0x22f   : > { %2558 = vmatprep.subr.bf16.mxu1 %v4631_v10 }
 0x230   : > { %1997 = vmatmul.mubr.bf16.gmra.mxu1 %v1260_v6  ;;  %2069 = vmatmul.mubr.bf16.gmra.mxu0 %v1260_v6  ;;  %v4628_v6 = vld [vmem:[#allocation11 + $0x164] ss:$8 sps:$4 sm:$0xff]  }
 0x231   : > { %2004 = vmatprep.mubr.bf16.mxu1 %v1263_v23  ;;  %2076 = vmatprep.mubr.bf16.mxu0 %v1263_v23  ;;  %v4641_v23 = vld [vmem:[#allocation11 + $0x10] ss:$8 sps:$4 sm:$0xff]  }
 0x232   : > { %2613 = vmatprep.subr.bf16.mxu0 %v4628_v6  ;;  %2559 = vmatpush1.bf16.msra.mxu1 %v4629_v12 }
 0x233   : > { %2614 = vmatpush1.bf16.msra.mxu0 %v4626_v9  ;;  %2560 = vmatprep.subr.bf16.mxu1 %v4637_v16 }
 0x234   : > { %2615 = vmatprep.subr.bf16.mxu0 %v4634_v11 }
 0x236   : > { %2561 = vmatpush1.bf16.msra.mxu1 %v4635_v19 }
 0x237   : > { %2616 = vmatpush1.bf16.msra.mxu0 %v4632_v14  ;;  %2562 = vmatprep.subr.bf16.mxu1 %v4643_v21 }
 0x238   : > { %2005 = vmatmul.mubr.bf16.gmra.mxu1 %v1262_v25  ;;  %2077 = vmatmul.mubr.bf16.gmra.mxu0 %v1262_v25  ;;  %v4649_v25 = vld [vmem:[#allocation11 + $0x4] ss:$8 sps:$4 sm:$0xff]  }
 0x239   : > { %2012 = vmatprep.mubr.bf16.mxu1 %v1265_v53  ;;  %2084 = vmatprep.mubr.bf16.mxu0 %v1265_v53  ;;  %v4694_v53 = vld [vmem:[#allocation11 + $0x1b4] ss:$8 sps:$4 sm:$0xff]  }
 0x23a   : > { %2617 = vmatprep.subr.bf16.mxu0 %v4640_v17  ;;  %2563 = vmatpush1.bf16.msra.mxu1 %v4641_v23 }
 0x23b   : > { %2618 = vmatpush1.bf16.msra.mxu0 %v4638_v20  ;;  %2564 = vmatprep.subr.bf16.mxu1 %v4649_v25 }
 0x23c   : > { %2619 = vmatprep.subr.bf16.mxu0 %v4646_v22 }
 0x23e   : > { %2565 = vmatpush1.bf16.msra.mxu1 %v4647_v27 }
 0x23f   : > { %2620 = vmatpush1.bf16.msra.mxu0 %v4644_v24  ;;  %2566 = vmatprep.subr.bf16.mxu1 %v4655_v29 }
 0x240   : > { %2013 = vmatmul.mubr.bf16.gmra.mxu1 %v1264_v58  ;;  %2085 = vmatmul.mubr.bf16.gmra.mxu0 %v1264_v58  ;;  %v4695_v58 = vld [vmem:[#allocation11 + $0x80] ss:$8 sps:$4 sm:$0xff]  }
 0x241   : > { %2020 = vmatprep.mubr.bf16.mxu1 %v1273_v59  ;;  %2092 = vmatprep.mubr.bf16.mxu0 %v1267_v60  ;;  %v4698_v59 = vld [vmem:[#allocation11 + $0x1a0] ss:$8 sps:$4 sm:$0xff]   ;;  %v4703_v60 = vld [vmem:[#allocation11 + $0x194] ss:$8 sps:$4 sm:$0xff]  }
 0x242   : > { %2621 = vmatprep.subr.bf16.mxu0 %v4652_v26  ;;  %2567 = vmatpush2.bf16.msra.mxu1 %v4653_v31 }
 0x243   : > { %2622 = vmatpush1.bf16.msra.mxu0 %v4650_v28  ;;  %2568 = vmatprep.subr.bf16.mxu1 %v4661_v33 }
 0x244   : > { %2623 = vmatprep.subr.bf16.mxu0 %v4658_v30 }
 0x246   : > { %2569 = vmatpush2.bf16.msra.mxu1 %v4659_v35 }
 0x247   : > { %2624 = vmatpush1.bf16.msra.mxu0 %v4656_v32  ;;  %2570 = vmatprep.subr.bf16.mxu1 %v4667_v38 }
 0x248   : > { %2021 = vmatmul.mubr.bf16.gmra.mxu1 %v1272_v3  ;;  %2093 = vmatmul.mubr.bf16.gmra.mxu0 %v1266_v4 }
 0x249   : > { %2100 = vmatprep.mubr.bf16.mxu0 %v4943_v7  ;;  %2625 = vmatprep.subr.bf16.mxu0 %v4664_v34 }
 0x24a   : > { %2571 = vmatpush2.bf16.msra.mxu1 %v4665_v13 }
 0x24b   : > { %2626 = vmatpush1.bf16.msra.mxu0 %v4662_v37  ;;  %2572 = vmatprep.subr.bf16.mxu1 %v4673_v42 }
 0x24c   : > { %2627 = vmatprep.subr.bf16.mxu0 %v4670_v40 }
 0x24e   : > { %2573 = vmatpush2.bf16.msra.mxu1 %v4671_v18 }
 0x24f   : > { %2628 = vmatpush2.bf16.msra.mxu0 %v4668_v41  ;;  %2574 = vmatprep.subr.bf16.mxu1 %v4679_v46 }
 0x250   : > { %2101 = vmatmul.mubr.bf16.gmra.mxu0 %v1274_v15  ;;  %2629 = vmatprep.subr.bf16.mxu0 %v4676_v43 }
 0x252   : > { %2575 = vmatpush2.bf16.msra.mxu1 %v4677_v39 }
 0x253   : > { %2630 = vmatpush2.bf16.msra.mxu0 %v4674_v44  ;;  %2576 = vmatprep.subr.bf16.mxu1 %v4685_v49 }
 0x254   : > { %2631 = vmatprep.subr.bf16.mxu0 %v4682_v47 }
 0x256   : > { %2577 = vmatpush2.bf16.msra.mxu1 %v4683_v51 }
 0x257   : > { %2632 = vmatpush2.bf16.msra.mxu0 %v4680_v48  ;;  %2578 = vmatprep.subr.bf16.mxu1 %v4691_v52 }
 0x258   : > { %2633 = vmatprep.subr.bf16.mxu0 %v4688_v50 }
 0x25a   : > { %2579 = vmatpush2.bf16.msra.mxu1 %v4689_v54 }
 0x25b   : > { %2634 = vmatpush2.bf16.msra.mxu0 %v4686_v45  ;;  %2580 = vmatprep.subr.bf16.mxu1 %v4697_v56 }
 0x25c   : > { %2635 = vmatprep.subr.bf16.mxu0 %v4694_v53 }
 0x25e   : > { %2581 = vmatpush2.bf16.msra.mxu1 %v4695_v58 }
 0x25f   : > { %2636 = vmatpush2.bf16.msra.mxu0 %v4692_v55  ;;  %4294 = vmatprep.subr.bf16.mxu1 %v4707_v0 }
 0x260   : > { %2637 = vmatprep.subr.bf16.mxu0 %v4700_v57 }
 0x263   : > { %2638 = vmatpush2.bf16.msra.mxu0 %v4698_v59 }
 0x264   : > { %2639 = vmatprep.subr.bf16.mxu0 %v4703_v60 }
 0x267   : > { %2640 = vmatpush2.bf16.msra.mxu0 %v4701_v61 }
 0x268   : > { %2641 = vmatprep.subr.bf16.mxu0 %v4706_v62 }
 0x26b   : > { %2642 = vmatpush2.bf16.msra.mxu0 %v4704_v63 }
 0x2b0   : > { %v4102_v1 = vpop.f32.mrf.mxu1 }
 0x2b2   : > { %v4103_v2 = vpop.f32.mrf.mxu1 }
 0x2b3   : > { %v4104_v60 = vadd.f32 %v4103_v2, %v4102_v1 }
 0x2b4   : > { %v4105_v3 = vpop.f32.mrf.mxu1 }
 0x2b6   : > { %v4106_v4 = vpop.f32.mrf.mxu1 }
 0x2b7   : > { %v4107_v61 = vadd.f32 %v4106_v4, %v4105_v3 }
 0x2b8   : > { %v5162_v5 = vpop.f32.mrf.mxu1  ;;  %v4154_v6 = vpop.f32.mrf.mxu0 }
 0x2ba   : > { %v4109_v7 = vpop.f32.mrf.mxu1  ;;  %v4155_v8 = vpop.f32.mrf.mxu0 }
 0x2bb   : > { %v4156_v56 = vadd.f32 %v4155_v8, %v4154_v6 }
 0x2bc   : > { %v5164_v9 = vpop.f32.mrf.mxu1  ;;  %v4157_v10 = vpop.f32.mrf.mxu0 }
 0x2be   : > { %v5166_v11 = vpop.f32.mrf.mxu1  ;;  %v4158_v12 = vpop.f32.mrf.mxu0 }
 0x2bf   : > { %v4159_v57 = vadd.f32 %v4158_v12, %v4157_v10 }
 0x2c0   : > { %v5168_v14 = vpop.f32.mrf.mxu1  ;;  %v4160_v15 = vpop.f32.mrf.mxu0 }
 0x2c1   : > { %v1906_v36 = vadd.f32 %v4159_v57, %v4107_v61 }
 0x2c2   : > { %v5170_v16 = vpop.f32.mrf.mxu1  ;;  %v4161_v17 = vpop.f32.mrf.mxu0 }
 0x2c4   : > { %v5172_v19 = vpop.f32.mrf.mxu1  ;;  %v4163_v20 = vpop.f32.mrf.mxu0 }
 0x2c6   : > { %v5174_v21 = vpop.f32.mrf.mxu1  ;;  %v4164_v22 = vpop.f32.mrf.mxu0 }
 0x2c7   : > { %v4165_v2 = vadd.f32 %v4164_v22, %v4163_v20  ;;  %v4116_v20 = vadd.f32 %v5170_v16, %v5168_v14  ;;  %v4119_v14 = vadd.f32 %v5174_v21, %v5172_v19  ;;  %v4709_v19 = vld [vmem:[%s5558_s5 + $0x70] sm:$0xff]  }
 0x2c8   : > { %v5176_v23 = vpop.f32.mrf.mxu1  ;;  %v5178_v24 = vpop.f32.mrf.mxu0 }
 0x2ca   : > { %v5180_v25 = vpop.f32.mrf.mxu1  ;;  %v5182_v26 = vpop.f32.mrf.mxu0 }
 0x2cc   : > { %v5184_v27 = vpop.f32.mrf.mxu1  ;;  %v5186_v28 = vpop.f32.mrf.mxu0 }
 0x2ce   : > { %v5188_v29 = vpop.f32.mrf.mxu1  ;;  %v5190_v30 = vpop.f32.mrf.mxu0 }
 0x2d0   : > { %v5192_v31 = vpop.f32.mrf.mxu1  ;;  %v5194_v32 = vpop.f32.mrf.mxu0 }
 0x2d2   : > { %v5196_v33 = vpop.f32.mrf.mxu1  ;;  %v5198_v34 = vpop.f32.mrf.mxu0 }
 0x2d4   : > { %v5200_v35 = vpop.f32.mrf.mxu1  ;;  %v5202_v37 = vpop.f32.mrf.mxu0 }
 0x2d6   : > { %v5204_v38 = vpop.f32.mrf.mxu1  ;;  %v5206_v40 = vpop.f32.mrf.mxu0 }
 0x2d7   : > { %5571 = vst [vmem:[#allocation16_spill] sm:$0xff] %v5204_v38 }
 0x2d8   : > { %v5208_v13 = vpop.f32.mrf.mxu1  ;;  %v5210_v41 = vpop.f32.mrf.mxu0 }
 0x2d9   : > { %5572 = vst [vmem:[#allocation17_spill] sm:$0xff] %v5208_v13 }
 0x2da   : > { %v5212_v42 = vpop.f32.mrf.mxu1  ;;  %v5214_v43 = vpop.f32.mrf.mxu0 }
 0x2db   : > { %5573 = vst [vmem:[#allocation18_spill] sm:$0xff] %v5212_v42  ;;  %v4162_v42 = vadd.f32 %v4161_v17, %v4160_v15  ;;  %v4113_v15 = vadd.f32 %v5166_v11, %v5164_v9 }
 0x2dc   : > { %v4135_v18 = vpop.f32.mrf.mxu1  ;;  %v5216_v44 = vpop.f32.mrf.mxu0 }
 0x2de   : > { %v4136_v46 = vpop.f32.mrf.mxu1  ;;  %v5218_v47 = vpop.f32.mrf.mxu0 }
 0x2df   : > { %v1903_v46 = vadd.f32 %v4156_v56, %v4104_v60 }
 0x2e0   : > { %v5220_v39 = vpop.f32.mrf.mxu0  ;;  %v4206_v48 = vpop.f32.mrf.mxu1 }
 0x2e1   : > { %5574 = vst [vmem:[#allocation19_spill] sm:$0xff] %v5220_v39 }
 0x2e2   : > { %v5222_v49 = vpop.f32.mrf.mxu0  ;;  %v4207_v50 = vpop.f32.mrf.mxu1 }
 0x2e3   : > { %5575 = vst [vmem:[#allocation20_spill] sm:$0xff] %v5222_v49  ;;  %v4208_v62 = vadd.f32 %v4207_v50, %v4206_v48 }
 0x2e4   : > { %v4187_v51 = vpop.f32.mrf.mxu0  ;;  %v4209_v45 = vpop.f32.mrf.mxu1 }
 0x2e5   : > { %v4110_v51 = vadd.f32 %v4109_v7, %v5162_v5  ;;  %v1983_v39 = vadd.f32 %v4208_v62, %v1903_v46  ;;  %v4168_v7 = vadd.f32 %v5182_v26, %v5178_v24  ;;  %v4171_v26 = vadd.f32 %v5190_v30, %v5186_v28 }
 0x2e6   : > { %v4188_v52 = vpop.f32.mrf.mxu0  ;;  %v4210_v53 = vpop.f32.mrf.mxu1 }
 0x2e7   : > { %v4211_v63 = vadd.f32 %v4210_v53, %v4209_v45  ;;  %v1911_v1 = vadd.f32 %v4162_v42, %v4110_v51  ;;  %v1919_v56 = vadd.f32 %v4168_v7, %v4116_v20  ;;  %v4708_v51 = vld [vmem:[%s5558_s5 + $0x38] sm:$0xff]   ;;  %v1922_v21 = vadd.f32 %v4171_v26, %v4119_v14 }
 0x2e8   : > { %v4212_v54 = vpop.f32.mrf.mxu1  ;;  %v4258_v55 = vpop.f32.mrf.mxu0 }
 0x2e9   : > { %v1986_v38 = vadd.f32 %v4211_v63, %v1906_v36 }
 0x2ea   : > { %v4213_v58 = vpop.f32.mrf.mxu1  ;;  %v4259_v59 = vpop.f32.mrf.mxu0 }
 0x2eb   : > { %v4260_v13 = vadd.f32 %v4259_v59, %v4258_v55  ;;  %v4214_v6 = vadd.f32 %v4213_v58, %v4212_v54  ;;  %v1914_v54 = vadd.f32 %v4165_v2, %v4113_v15 }
 0x2ec   : > { %v4215_v0 = vpop.f32.mrf.mxu1  ;;  %v4261_v18 = vpop.f32.mrf.mxu0 }
 0x2ed   : > { %v2063_v3 = vadd.f32 %v4260_v13, %v1983_v39  ;;  %v1991_v17 = vadd.f32 %v4214_v6, %v1911_v1  ;;  %v4122_v1 = vadd.f32 %v5180_v25, %v5176_v23  ;;  %v4711_v23 = vld [vmem:[%s5558_s5 + $0x68] sm:$0xff]  }
 0x2ee   : > { %v4216_v52 = vpop.f32.mrf.mxu1  ;;  %v4262_v49 = vpop.f32.mrf.mxu0 }
 0x2ef   : > { %v4263_v8 = vadd.f32 %v4262_v49, %v4261_v18  ;;  %v4217_v45 = vadd.f32 %v4216_v52, %v4215_v0  ;;  %v2108_v55 = vmul.f32 0.2, %v2063_v3  ;;  %v5576_v52 = vmov 0.0  }
 0x2f0   : > { %v4218_v10 = vpop.f32.mrf.mxu1  ;;  %v4264_v12 = vpop.f32.mrf.mxu0 }
 0x2f1   : > { %v2066_v4 = vadd.f32 %v4263_v8, %v1986_v38  ;;  %v1994_v13 = vadd.f32 %v4217_v45, %v1914_v54  ;;  %v2119_v59 = vmax.f32 %v2063_v3, %v2108_v55 }
 0x2f2   : > { %v4219_v48 = vpop.f32.mrf.mxu1  ;;  %v4265_v50 = vpop.f32.mrf.mxu0 }
 0x2f3   : > { %v4266_v5 = vadd.f32 %v4265_v50, %v4264_v12  ;;  %v2109_v36 = vmul.f32 0.2, %v2066_v4  ;;  %v4220_v39 = vadd.f32 %v4219_v48, %v4218_v10  ;;  %v4174_v10 = vadd.f32 %v5198_v34, %v5194_v32 }
 0x2f4   : > { %v4221_v53 = vpop.f32.mrf.mxu1  ;;  %v4267_v49 = vpop.f32.mrf.mxu0 }
 0x2f5   : > { %v2071_v42 = vadd.f32 %v4266_v5, %v1991_v17  ;;  %v5231_v57 = vmax.f32 %v2066_v4, %v2109_v36  ;;  %v1999_v63 = vadd.f32 %v4220_v39, %v1919_v56  ;;  %v4710_v17 = vld [vmem:[%s5558_s5 + $0x30] sm:$0xff]   ;;  %v1927_v25 = vadd.f32 %v4174_v10, %v4122_v1  ;;  %v5578_v10 = vld [vmem:[#allocation19_spill] sm:$0xff]  ;;  %v5580_v1 = vld [vmem:[#allocation17_spill] sm:$0xff] }
 0x2f6   : > { %v4222_v22 = vpop.f32.mrf.mxu1  ;;  %v4268_v38 = vpop.f32.mrf.mxu0  ;;  %v4177_v5 = vadd.f32 %v5206_v40, %v5202_v37  ;;  %v4128_v56 = vadd.f32 %v5196_v33, %v5192_v31  ;;  %v5577_v31 = vld [vmem:[#allocation16_spill] sm:$0xff] }
 0x2f7   : > { %v2110_v9 = vmul.f32 0.2, %v2071_v42  ;;  %v4269_v11 = vadd.f32 %v4268_v38, %v4267_v49  ;;  %v4223_v0 = vadd.f32 %v4222_v22, %v4221_v53  ;;  %v2154_v6 = vpack.c.bf16 %v5231_v57, %v5576_v52  ;;  %v4712_v38 = vld [vmem:[%s5558_s5 + $0x28] sm:$0xff]  }
 0x2f8   : > { %v4224_v58 = vpop.f32.mrf.mxu1  ;;  %v4270_v24 = vpop.f32.mrf.mxu0  ;;  %v4125_v53 = vadd.f32 %v5188_v29, %v5184_v27  ;;  %v4713_v27 = vld [vmem:[%s5558_s5 + $0x60] sm:$0xff]   ;;  %v4131_v33 = vadd.f32 %v5577_v31, %v5200_v35  ;;  %v4731_v31 = vld [vmem:[%s5558_s5 + $0xf8] sm:$0xff]  }
 0x2f9   : > { %v2121_v60 = vmax.f32 %v2071_v42, %v2110_v9  ;;  %v2074_v61 = vadd.f32 %v4269_v11, %v1994_v13  ;;  %v2002_v4 = vadd.f32 %v4223_v0, %v1922_v21  ;;  %v4180_v9 = vadd.f32 %v5214_v43, %v5210_v41 }
 0x2fa   : > { %v4225_v16 = vpop.f32.mrf.mxu1  ;;  %v4271_v62 = vpop.f32.mrf.mxu0  ;;  %v1930_v29 = vadd.f32 %v4177_v5, %v4125_v53  ;;  %v4183_v41 = vadd.f32 %v5218_v47, %v5216_v44 }
 0x2fb   : > { %v4272_v18 = vadd.f32 %v4271_v62, %v4270_v24  ;;  %v2155_v46 = vpack.c.bf16 %v2121_v60, %v2119_v59  ;;  %v2111_v28 = vmul.f32 0.2, %v2074_v61  ;;  %v4226_v48 = vadd.f32 %v4225_v16, %v4224_v58 }
 0x2fc   : > { %v4227_v30 = vpop.f32.mrf.mxu1  ;;  %v4273_v8 = vpop.f32.mrf.mxu0  ;;  %v1935_v62 = vadd.f32 %v4180_v9, %v4128_v56  ;;  %v1938_v21 = vadd.f32 %v4183_v41, %v4131_v33  ;;  %v4715_v9 = vld [vmem:[%s5558_s5 + $0x58] sm:$0xff]   ;;  %v4728_v41 = vld [vmem:[%s5558_s5 + $0x160] sm:$0xff]  }
 0x2fd   : > { %v2079_v12 = vadd.f32 %v4272_v18, %v1999_v63  ;;  %2582 = vmatprep.mubr.bf16.mxu1 %v2155_v46  ;;  %v5252_v45 = vmax.f32 %v2074_v61, %v2111_v28  ;;  %v2007_v55 = vadd.f32 %v4226_v48, %v1927_v25  ;;  %v4717_v56 = vld [vmem:[%s5558_s5 + $0x18] sm:$0xff]  }
 0x2fe   : > { %v4228_v2 = vpop.f32.mrf.mxu1  ;;  %v4274_v3 = vpop.f32.mrf.mxu0  ;;  %2583 = vmatmul.mubr.bf16.vlgmr.msra.gmra.mxu1 %v2154_v6  ;;  %v4732_v33 = vld [vmem:[%s5558_s5 + $0x158] sm:$0xff]  }
 0x2ff   : > { %v2112_v50 = vmul.f32 0.2, %v2079_v12  ;;  %v4275_v15 = vadd.f32 %v4274_v3, %v4273_v8  ;;  %4295 = vmatpush3.bf16.msra.mxu1 %v4708_v51  ;;  %v4229_v42 = vadd.f32 %v4228_v2, %v4227_v30  ;;  %v2156_v13 = vpack.c.bf16 %v5252_v45, %v5231_v57  ;;  %v5581_v2 = vld [vmem:[#allocation18_spill] sm:$0xff] }
 0x300   : > { %v4230_v32 = vpop.f32.mrf.mxu1  ;;  %v4276_v34 = vpop.f32.mrf.mxu0  ;;  %4296 = vmatprep.subr.bf16.mxu1 %v4709_v19  ;;  %v4134_v35 = vadd.f32 %v5581_v2, %v5580_v1 }
 0x301   : > { %v2123_v7 = vmax.f32 %v2079_v12, %v2112_v50  ;;  %v2082_v36 = vadd.f32 %v4275_v15, %v2002_v4  ;;  %v2010_v57 = vadd.f32 %v4229_v42, %v1930_v29  ;;  %v5579_v12 = vld [vmem:[#allocation20_spill] sm:$0xff]  ;;  %v4714_v29 = vld [vmem:[%s5558_s5 + $0x20] sm:$0xff]  }
 0x302   : > { %v4231_v49 = vpop.f32.mrf.mxu1  ;;  %v4277_v54 = vpop.f32.mrf.mxu0  ;;  %v4186_v44 = vadd.f32 %v5579_v12, %v5578_v10 }
 0x303   : > { %v4278_v20 = vadd.f32 %v4277_v54, %v4276_v34  ;;  %v2157_v22 = vpack.c.bf16 %v2123_v7, %v2121_v60  ;;  %4297 = vmatpush3.bf16.msra.mxu1 %v4710_v17  ;;  %v2113_v37 = vmul.f32 0.2, %v2082_v36  ;;  %v4232_v26 = vadd.f32 %v4231_v49, %v4230_v32 }
 0x304   : > { %v4233_v40 = vpop.f32.mrf.mxu1  ;;  %v4279_v39 = vpop.f32.mrf.mxu0  ;;  %4298 = vmatprep.subr.bf16.mxu1 %v4711_v23  ;;  %v1943_v23 = vadd.f32 %v4186_v44, %v4134_v35 }
 0x305   : > { %v2087_v11 = vadd.f32 %v4278_v20, %v2007_v55  ;;  %2643 = vmatprep.mubr.bf16.mxu0 %v2157_v22  ;;  %v2124_v61 = vmax.f32 %v2082_v36, %v2113_v37  ;;  %v2015_v46 = vadd.f32 %v4232_v26, %v1935_v62  ;;  %v4721_v26 = vld [vmem:[%s5558_s5 + $0x10] sm:$0xff]   ;;  %v4727_v62 = vld [vmem:[%s5558_s5 + $0x40] sm:$0xff]  }
 0x306   : > { %v4234_v58 = vpop.f32.mrf.mxu1  ;;  %v4280_v24 = vpop.f32.mrf.mxu0  ;;  %2644 = vmatmul.mubr.bf16.vlgmr.msra.gmra.mxu0 %v2156_v13 }
 0x307   : > { %v2114_v59 = vmul.f32 0.2, %v2087_v11  ;;  %v4281_v60 = vadd.f32 %v4280_v24, %v4279_v39  ;;  %4299 = vmatpush3.bf16.msra.mxu1 %v4712_v38  ;;  %v4235_v51 = vadd.f32 %v4234_v58, %v4233_v40  ;;  %v2158_v19 = vpack.c.bf16 %v2124_v61, %v5252_v45  ;;  %v4718_v58 = vld [vmem:[%s5558_s5 + $0x138] sm:$0xff]   ;;  %v4719_v24 = vld [vmem:[%s5558_s5 + $0x50] sm:$0xff]  }
 0x308   : > { %v4236_v14 = vpop.f32.mrf.mxu1  ;;  %v4282_v16 = vpop.f32.mrf.mxu0  ;;  %4300 = vmatprep.subr.bf16.mxu1 %v4713_v27 }
 0x309   : > { %v2125_v43 = vmax.f32 %v2087_v11, %v2114_v59  ;;  %v2090_v63 = vadd.f32 %v4281_v60, %v2010_v57  ;;  %v2018_v48 = vadd.f32 %v4235_v51, %v1938_v21  ;;  %v4716_v11 = vld [vmem:[%s5558_s5 + $0x178] sm:$0xff]   ;;  %v4720_v57 = vld [vmem:[%s5558_s5 + $0x170] sm:$0xff]   ;;  %v4723_v60 = vld [vmem:[%s5558_s5 + $0x48] sm:$0xff]  }
 0x30a   : > { %v4237_v0 = vpop.f32.mrf.mxu1  ;;  %v4283_v18 = vpop.f32.mrf.mxu0  ;;  %4338 = vmatprep.subr.bf16.mxu0 %v4716_v11  ;;  %v4722_v59 = vld [vmem:[%s5558_s5 + $0x130] sm:$0xff]   ;;  %v4740_v51 = vld [vmem:[%s5558_s5 + $0x148] sm:$0xff]  }
 0x30b   : > { %v4284_v52 = vadd.f32 %v4283_v18, %v4282_v16  ;;  %v2159_v6 = vpack.c.bf16 %v2125_v43, %v2123_v7  ;;  %v2115_v28 = vmul.f32 0.2, %v2090_v63  ;;  %v4238_v50 = vadd.f32 %v4237_v0, %v4236_v14  ;;  %4301 = vmatpush3.bf16.msra.mxu1 %v4714_v29  ;;  %4339 = vmatpush3.bf16.msra.mxu0 %v4718_v58  ;;  %v4725_v14 = vld [vmem:[%s5558_s5 + $0x8] sm:$0xff]   ;;  %v4734_v0 = vld [vmem:[%s5558_s5 + $0x118] sm:$0xff]   ;;  %v4736_v18 = vld [vmem:[%s5558_s5 + $0x150] sm:$0xff]  }
 0x30c   : > { %v4239_v30 = vpop.f32.mrf.mxu1  ;;  %v4285_v8 = vpop.f32.mrf.mxu0  ;;  %4302 = vmatprep.subr.bf16.mxu1 %v4715_v9  ;;  %4340 = vmatprep.subr.bf16.mxu0 %v4720_v57  ;;  %v4726_v16 = vld [vmem:[%s5558_s5 + $0x128] sm:$0xff]  }
 0x30d   : > { %v2095_v47 = vadd.f32 %v4284_v52, %v2015_v46  ;;  %2592 = vmatprep.mubr.bf16.mxu1 %v2159_v6  ;;  %v2126_v32 = vmax.f32 %v2090_v63, %v2115_v28  ;;  %v2023_v7 = vadd.f32 %v4238_v50, %v1943_v23  ;;  %v4730_v63 = vld [vmem:[%s5558_s5 + $0x120] sm:$0xff]   ;;  %v4738_v46 = vld [vmem:[%s5558_s5 + $0x110] sm:$0xff]   ;;  %v4742_v52 = vld [vmem:[%s5558_s5 + $0x108] sm:$0xff]  }
 0x30e   : > { %v4240_v3 = vpop.f32.mrf.mxu1  ;;  %v4286_v4 = vpop.f32.mrf.mxu0  ;;  %2593 = vmatmul.mubr.bf16.gmra.mxu1 %v2158_v19  ;;  %v4744_v6 = vld [vmem:[%s5558_s5 + $0x140] sm:$0xff]   ;;  %v4748_v30 = vld [vmem:[%s5558_s5 + $0x278] sm:$0xff]  }
 0x30f   : > { %v2116_v15 = vmul.f32 0.2, %v2095_v47  ;;  %v4287_v17 = vadd.f32 %v4286_v4, %v4285_v8  ;;  %v2160_v54 = vpack.c.bf16 %v2126_v32, %v2124_v61  ;;  %v2162_v20 = vpack.c.bf16 %v2126_v32, %v2126_v32  ;;  %4303 = vmatpush3.bf16.msra.mxu1 %v4717_v56  ;;  %4341 = vmatpush3.bf16.msra.mxu0 %v4722_v59  ;;  %v4724_v61 = vld [vmem:[%s5558_s5 + $0x168] sm:$0xff]   ;;  %v4746_v28 = vld [vmem:[%s5558_s5 + $0x100] sm:$0xff]   ;;  %v4733_v23 = vld [vmem:[%s5558_s5 + $0xb8] sm:$0xff]  }
 0x310   : > { %v4288_v34 = vpop.f32.mrf.mxu0  ;;  %4304 = vmatprep.subr.bf16.mxu1 %v4719_v24  ;;  %4342 = vmatprep.subr.bf16.mxu0 %v4724_v61  ;;  %v4745_v56 = vld [vmem:[%s5558_s5 + $0xa0] sm:$0xff]  }
 0x311   : > { %v2127_v45 = vmax.f32 %v2095_v47, %v2116_v15  ;;  %v2098_v25 = vadd.f32 %v4287_v17, %v2018_v48 }
 0x312   : > { %v4289_v5 = vpop.f32.mrf.mxu0 }
 0x313   : > { %v4290_v36 = vadd.f32 %v4289_v5, %v4288_v34  ;;  %v2163_v53 = vpack.c.bf16 %v2127_v45, %v2127_v45  ;;  %v2161_v49 = vpack.c.bf16 %v2127_v45, %v2125_v43  ;;  %v2117_v55 = vmul.f32 0.2, %v2098_v25  ;;  %4305 = vmatpush3.bf16.msra.mxu1 %v4721_v26  ;;  %4343 = vmatpush3.bf16.msra.mxu0 %v4726_v16  ;;  %v4729_v43 = vld [vmem:[%s5558_s5] sm:$0xff]   ;;  %v4735_v5 = vld [vmem:[%s5558_s5 + $0xf0] sm:$0xff]   ;;  %v4747_v26 = vld [vmem:[%s5558_s5 + $0xd8] sm:$0xff]  }
 0x314   : > { %v4291_v42 = vpop.f32.mrf.mxu0  ;;  %4306 = vmatprep.subr.bf16.mxu1 %v4723_v60  ;;  %4344 = vmatprep.subr.bf16.mxu0 %v4728_v41  ;;  %v4750_v16 = vld [vmem:[%s5558_s5 + $0x238] sm:$0xff]  }
 0x315   : > { %v2103_v22 = vadd.f32 %v4290_v36, %v2023_v7  ;;  %2602 = vmatprep.mubr.bf16.mxu1 %v2163_v53  ;;  %2653 = vmatprep.mubr.bf16.mxu0 %v2161_v49  ;;  %v2128_v37 = vmax.f32 %v2098_v25, %v2117_v55  ;;  %v4737_v49 = vld [vmem:[%s5558_s5 + $0xb0] sm:$0xff]   ;;  %v4739_v55 = vld [vmem:[%s5558_s5 + $0xe8] sm:$0xff]  }
 0x316   : > { %v4292_v38 = vpop.f32.mrf.mxu0  ;;  %2603 = vmatmul.mubr.bf16.gmra.mxu1 %v2162_v20  ;;  %2654 = vmatmul.mubr.bf16.gmra.mxu0 %v2160_v54 }
 0x317   : > { %v2118_v13 = vmul.f32 0.2, %v2103_v22  ;;  %v2164_v27 = vpack.c.bf16 %v2128_v37, %v2128_v37  ;;  %4307 = vmatpush3.bf16.msra.mxu1 %v4725_v14  ;;  %4345 = vmatpush3.bf16.msra.mxu0 %v4730_v63  ;;  %v4741_v38 = vld [vmem:[%s5558_s5 + $0xa8] sm:$0xff]   ;;  %v4749_v14 = vld [vmem:[%s5558_s5 + $0x98] sm:$0xff]   ;;  %v4752_v63 = vld [vmem:[%s5558_s5 + $0x270] sm:$0xff]  }
 0x318   : > { %4308 = vmatprep.subr.bf16.mxu1 %v4727_v62  ;;  %4346 = vmatprep.subr.bf16.mxu0 %v4732_v33 }
 0x319   : > { %v2129_v40 = vmax.f32 %v2103_v22, %v2118_v13 }
 0x31b   : > { %v2165_v39 = vpack.c.bf16 %v2129_v40, %v2129_v40  ;;  %4309 = vmatpush3.bf16.msra.mxu1 %v4729_v43  ;;  %4347 = vmatpush3.bf16.msra.mxu0 %v4734_v0  ;;  %v4743_v40 = vld [vmem:[%s5558_s5 + $0xe0] sm:$0xff]   ;;  %v4751_v43 = vld [vmem:[%s5558_s5 + $0xd0] sm:$0xff]  }
 0x31c   : > { %4316 = vmatprep.subr.bf16.mxu1 %v4731_v31  ;;  %4348 = vmatprep.subr.bf16.mxu0 %v4736_v18  ;;  %v4753_v18 = vld [vmem:[%s5558_s5 + $0x90] sm:$0xff]  }
 0x31d   : > { %2663 = vmatprep.mubr.bf16.mxu0 %v2165_v39 }
 0x31e   : > { %2664 = vmatmul.mubr.bf16.gmra.mxu0 %v2164_v27 }
 0x31f   : > { %4349 = vmatpush3.bf16.msra.mxu0 %v4738_v46  ;;  %v4754_v46 = vld [vmem:[%s5558_s5 + $0x230] sm:$0xff]  }
 0x320   : > { %4350 = vmatprep.subr.bf16.mxu0 %v4740_v51 }
 0x323   : > { %4351 = vmatpush3.bf16.msra.mxu0 %v4742_v52 }
 0x324   : > { %4352 = vmatprep.subr.bf16.mxu0 %v4744_v6  ;;  %v4755_v6 = vld [vmem:[%s5558_s5 + $0xc8] sm:$0xff]  }
 0x327   : > { %4353 = vmatpush3.bf16.msra.mxu0 %v4746_v28  ;;  %v4756_v28 = vld [vmem:[%s5558_s5 + $0x268] sm:$0xff]  }
 0x328   : > { %4382 = vmatprep.subr.bf16.mxu0 %v4748_v30 }
 0x3be   : > { %v2584_v8 = vpop.f32.mrf.mxu1 }
 0x3c0   : > { %v2586_v19 = vpop.f32.mrf.mxu1 }
 0x3c2   : > { %v5363_v12 = vpop.f32.mrf.mxu1 }
 0x3c4   : > { %v2590_v3 = vpop.f32.mrf.mxu1 }
 0x3c6   : > { %v2645_v21 = vpop.f32.mrf.mxu0 }
 0x3c7   : > { %v2646_v10 = vadd.f32 %v2645_v21, %v2584_v8  ;;  %v4757_v21 = vld [vmem:[%s5558_s5 + $0x88] sm:$0xff]  }
 0x3c8   : > { %v2647_v44 = vpop.f32.mrf.mxu0 }
 0x3c9   : > { %v2672_v47 = vmul.f32 0.2, %v2646_v10  ;;  %v2648_v1 = vadd.f32 %v2647_v44, %v2586_v19  ;;  %v4759_v44 = vld [vmem:[%s5558_s5 + $0xc0] sm:$0xff]  }
 0x3ca   : > { %v5365_v2 = vpop.f32.mrf.mxu0 }
 0x3cb   : > { %v2673_v35 = vmul.f32 0.2, %v2648_v1  ;;  %v2682_v4 = vmax.f32 %v2646_v10, %v2672_v47  ;;  %v2650_v51 = vadd.f32 %v5365_v2, %v5363_v12  ;;  %v4758_v10 = vld [vmem:[%s5558_s5 + $0x228] sm:$0xff]   ;;  %v4760_v47 = vld [vmem:[%s5558_s5 + $0x260] sm:$0xff]  }
 0x3cc   : > { %v2651_v48 = vpop.f32.mrf.mxu0  ;;  %v4761_v2 = vld [vmem:[%s5558_s5 + $0x80] sm:$0xff]  }
 0x3cd   : > { %v2683_v50 = vmax.f32 %v2648_v1, %v2673_v35  ;;  %v2652_v15 = vadd.f32 %v2651_v48, %v2590_v3  ;;  %v2712_v45 = vpack.c.bf16 %v2682_v4, %v2682_v4  ;;  %v2674_v12 = vmul.f32 0.2, %v2650_v51  ;;  %v4762_v35 = vld [vmem:[%s5558_s5 + $0x220] sm:$0xff]   ;;  %v4763_v4 = vld [vmem:[%s5558_s5 + $0x1f8] sm:$0xff]  }
 0x3ce   : > { %v2594_v17 = vpop.f32.mrf.mxu1  ;;  %v4764_v48 = vld [vmem:[%s5558_s5 + $0x258] sm:$0xff]  }
 0x3cf   : > { %v2713_v32 = vpack.c.bf16 %v2683_v50, %v2683_v50  ;;  %v2675_v34 = vmul.f32 0.2, %v2652_v15  ;;  %v2684_v3 = vmax.f32 %v2650_v51, %v2674_v12 }
 0x3d0   : > { %v2596_v25 = vpop.f32.mrf.mxu1 }
 0x3d1   : > { %v2685_v7 = vmax.f32 %v2652_v15, %v2675_v34  ;;  %3394 = vmatprep.mubr.bf16.mxu1 %v2713_v32  ;;  %v4765_v15 = vld [vmem:[%s5558_s5 + $0x1b8] sm:$0xff]   ;;  %v4767_v34 = vld [vmem:[%s5558_s5 + $0x1f0] sm:$0xff]  }
 0x3d2   : > { %v5373_v36 = vpop.f32.mrf.mxu1  ;;  %3395 = vmatmul.mubr.bf16.vlgmr.msra.gmra.mxu1 %v2712_v45  ;;  %v4766_v32 = vld [vmem:[%s5558_s5 + $0x218] sm:$0xff]   ;;  %v4768_v45 = vld [vmem:[%s5558_s5 + $0x250] sm:$0xff]  }
 0x3d3   : > { %v2715_v53 = vpack.c.bf16 %v2685_v7, %v2685_v7  ;;  %4317 = vmatpush3.bf16.msra.mxu1 %v4733_v23  ;;  %v4771_v7 = vld [vmem:[%s5558_s5 + $0x1e8] sm:$0xff]  }
 0x3d4   : > { %v2600_v54 = vpop.f32.mrf.mxu1  ;;  %4318 = vmatprep.subr.bf16.mxu1 %v4735_v5  ;;  %v4770_v5 = vld [vmem:[%s5558_s5 + $0x210] sm:$0xff]  }
 0x3d5   : > { %3434 = vmatprep.mubr.bf16.mxu1 %v2715_v53 }
 0x3d6   : > { %v5381_v42 = vpop.f32.mrf.mxu1  ;;  %v2655_v20 = vpop.f32.mrf.mxu0 }
 0x3d7   : > { %v2656_v22 = vadd.f32 %v2655_v20, %v2594_v17  ;;  %4319 = vmatpush3.bf16.msra.mxu1 %v4737_v49  ;;  %v2714_v17 = vpack.c.bf16 %v2684_v3, %v2684_v3  ;;  %v4772_v49 = vld [vmem:[%s5558_s5 + $0x248] sm:$0xff]  }
 0x3d8   : > { %v2606_v13 = vpop.f32.mrf.mxu1  ;;  %v2657_v37 = vpop.f32.mrf.mxu0  ;;  %4320 = vmatprep.subr.bf16.mxu1 %v4739_v55  ;;  %v4774_v55 = vld [vmem:[%s5558_s5 + $0x208] sm:$0xff]  }
 0x3d9   : > { %v2676_v39 = vmul.f32 0.2, %v2656_v22  ;;  %v2658_v27 = vadd.f32 %v2657_v37, %v2596_v25  ;;  %v4769_v25 = vld [vmem:[%s5558_s5 + $0x1b0] sm:$0xff]   ;;  %v4779_v37 = vld [vmem:[%s5558_s5 + $0x1d8] sm:$0xff]  }
 0x3da   : > { %v2608_v29 = vpop.f32.mrf.mxu1  ;;  %v5389_v9 = vpop.f32.mrf.mxu0 }
 0x3db   : > { %v2677_v11 = vmul.f32 0.2, %v2658_v27  ;;  %4321 = vmatpush3.bf16.msra.mxu1 %v4741_v38  ;;  %v2686_v58 = vmax.f32 %v2656_v22, %v2676_v39  ;;  %v4776_v22 = vld [vmem:[%s5558_s5 + $0x240] sm:$0xff]   ;;  %v4780_v39 = vld [vmem:[%s5558_s5 + $0x198] sm:$0xff]  }
 0x3dc   : > { %v2609_v24 = vpop.f32.mrf.mxu1  ;;  %v2661_v57 = vpop.f32.mrf.mxu0  ;;  %4322 = vmatprep.subr.bf16.mxu1 %v4743_v40  ;;  %v4777_v38 = vld [vmem:[%s5558_s5 + $0x1a0] sm:$0xff]  }
 0x3dd   : > { %v2687_v59 = vmax.f32 %v2658_v27, %v2677_v11  ;;  %v2716_v62 = vpack.c.bf16 %v2686_v58, %v2686_v58  ;;  %v2662_v30 = vadd.f32 %v2661_v57, %v2600_v54  ;;  %v4773_v54 = vld [vmem:[%s5558_s5 + $0x1a8] sm:$0xff]   ;;  %v4781_v27 = vld [vmem:[%s5558_s5 + $0x1d0] sm:$0xff]  }
 0x3de   : > { %v5397_v60 = vpop.f32.mrf.mxu0  ;;  %v4782_v11 = vld [vmem:[%s5558_s5 + $0x190] sm:$0xff]   ;;  %v4783_v58 = vld [vmem:[%s5558_s5 + $0x1c8] sm:$0xff]  }
 0x3df   : > { %v2717_v61 = vpack.c.bf16 %v2687_v59, %v2687_v59  ;;  %4323 = vmatpush3.bf16.msra.mxu1 %v4745_v56  ;;  %v2679_v1 = vmul.f32 0.2, %v2662_v30  ;;  %v2666_v53 = vadd.f32 %v5397_v60, %v5381_v42  ;;  %v4775_v42 = vld [vmem:[%s5558_s5 + $0x1e0] sm:$0xff]   ;;  %v2660_v56 = vadd.f32 %v5389_v9, %v5373_v36  ;;  %v4784_v24 = vld [vmem:[%s5558_s5 + $0x188] sm:$0xff]  }
 0x3e0   : > { %v2667_v41 = vpop.f32.mrf.mxu0  ;;  %4324 = vmatprep.subr.bf16.mxu1 %v4747_v26  ;;  %v4785_v26 = vld [vmem:[%s5558_s5 + $0x1c0] sm:$0xff]  }
 0x3e1   : > { %v2668_v31 = vadd.f32 %v2667_v41, %v2606_v13  ;;  %3474 = vmatprep.mubr.bf16.mxu0 %v2717_v61  ;;  %v2689_v50 = vmax.f32 %v2662_v30, %v2679_v1  ;;  %v2680_v20 = vmul.f32 0.2, %v2666_v53  ;;  %v4778_v13 = vld [vmem:[%s5558_s5 + $0x200] sm:$0xff]   ;;  %v2678_v57 = vmul.f32 0.2, %v2660_v56 }
 0x3e2   : > { %v2669_v33 = vpop.f32.mrf.mxu0  ;;  %3475 = vmatmul.mubr.bf16.vlgmr.msra.gmra.mxu0 %v2716_v62  ;;  %v4786_v36 = vld [vmem:[%s5558_s5 + $0x180] sm:$0xff]  }
 0x3e3   : > { %v2681_v0 = vmul.f32 0.2, %v2668_v31  ;;  %4325 = vmatpush3.bf16.msra.mxu1 %v4749_v14  ;;  %4383 = vmatpush3.bf16.msra.mxu0 %v4750_v16  ;;  %v2719_v23 = vpack.c.bf16 %v2689_v50, %v2689_v50  ;;  %v2690_v40 = vmax.f32 %v2666_v53, %v2680_v20  ;;  %v2688_v9 = vmax.f32 %v2660_v56, %v2678_v57 }
 0x3e4   : > { %v2670_v52 = vpop.f32.mrf.mxu0  ;;  %4326 = vmatprep.subr.bf16.mxu1 %v4751_v43  ;;  %4384 = vmatprep.subr.bf16.mxu0 %v4752_v63 }
 0x3e5   : > { %v2691_v8 = vmax.f32 %v2668_v31, %v2681_v0  ;;  %v2720_v29 = vpack.c.bf16 %v2690_v40, %v2690_v40  ;;  %v2718_v59 = vpack.c.bf16 %v2688_v9, %v2688_v9 }
 0x3e7   : > { %v2721_v19 = vpack.c.bf16 %v2691_v8, %v2691_v8  ;;  %4327 = vmatpush3.bf16.msra.mxu1 %v4753_v18  ;;  %4385 = vmatpush3.bf16.msra.mxu0 %v4754_v46 }
 0x3e8   : > { %4328 = vmatprep.subr.bf16.mxu1 %v4755_v6  ;;  %4386 = vmatprep.subr.bf16.mxu0 %v4756_v28 }
 0x3e9   : > { %3554 = vmatprep.mubr.bf16.mxu0 %v2721_v19 }
 0x3eb   : > { %4329 = vmatpush3.bf16.msra.mxu1 %v4757_v21  ;;  %4387 = vmatpush3.bf16.msra.mxu0 %v4758_v10 }
 0x3ec   : > { %4330 = vmatprep.subr.bf16.mxu1 %v4759_v44  ;;  %4388 = vmatprep.subr.bf16.mxu0 %v4760_v47 }
 0x3ef   : > { %4331 = vmatpush3.bf16.msra.mxu1 %v4761_v2  ;;  %4389 = vmatpush3.bf16.msra.mxu0 %v4762_v35 }
 0x3f0   : > { %4360 = vmatprep.subr.bf16.mxu1 %v4763_v4  ;;  %4390 = vmatprep.subr.bf16.mxu0 %v4764_v48 }
 0x3f2   : > { %3435 = vmatmul.mubr.bf16.vlgmr.msra.gmra.mxu1 %v2714_v17 }
 0x3f3   : > { %4361 = vmatpush3.bf16.msra.mxu1 %v4765_v15  ;;  %3514 = vmatprep.mubr.bf16.mxu1 %v2719_v23 }
 0x3f4   : > { %4391 = vmatpush3.bf16.msra.mxu0 %v4766_v32  ;;  %4362 = vmatprep.subr.bf16.mxu1 %v4767_v34 }
 0x3f5   : > { %4392 = vmatprep.subr.bf16.mxu0 %v4768_v45 }
 0x3f7   : > { %4363 = vmatpush3.bf16.msra.mxu1 %v4769_v25 }
 0x3f8   : > { %4393 = vmatpush3.bf16.msra.mxu0 %v4770_v5  ;;  %4364 = vmatprep.subr.bf16.mxu1 %v4771_v7 }
 0x3f9   : > { %4394 = vmatprep.subr.bf16.mxu0 %v4772_v49 }
 0x3fb   : > { %4365 = vmatpush3.bf16.msra.mxu1 %v4773_v54 }
 0x3fc   : > { %4395 = vmatpush3.bf16.msra.mxu0 %v4774_v55  ;;  %4366 = vmatprep.subr.bf16.mxu1 %v4775_v42 }
 0x3fd   : > { %4396 = vmatprep.subr.bf16.mxu0 %v4776_v22 }
 0x3ff   : > { %4367 = vmatpush3.bf16.msra.mxu1 %v4777_v38 }
 0x400   : > { %4397 = vmatpush3.bf16.msra.mxu0 %v4778_v13  ;;  %4368 = vmatprep.subr.bf16.mxu1 %v4779_v37 }
 0x403   : > { %3555 = vmatmul.mubr.bf16.vlgmr.msra.gmra.mxu0 %v2720_v29  ;;  %4369 = vmatpush3.bf16.msra.mxu1 %v4780_v39 }
 0x404   : > { %4370 = vmatprep.subr.bf16.mxu1 %v4781_v27 }
 0x407   : > { %4371 = vmatpush3.bf16.msra.mxu1 %v4782_v11 }
 0x408   : > { %4372 = vmatprep.subr.bf16.mxu1 %v4783_v58 }
 0x40b   : > { %4373 = vmatpush3.bf16.msra.mxu1 %v4784_v24 }
 0x40c   : > { %4374 = vmatprep.subr.bf16.mxu1 %v4785_v26 }
 0x40f   : > { %4375 = vmatpush3.bf16.msra.mxu1 %v4786_v36 }
 0x412   : > { %3515 = vmatmul.mubr.bf16.vlgmr.msra.gmra.mxu1 %v2718_v59 }
 0x492   : > { %v4310_v60 = vpop.f32.mrf.mxu1 }
 0x494   : > { %v4311_v61 = vpop.f32.mrf.mxu1 }
 0x495   : > { %v4312_v30 = vadd.f32 %v4311_v61, %v4310_v60 }
 0x496   : > { %v4313_v14 = vpop.f32.mrf.mxu1 }
 0x498   : > { %v4314_v16 = vpop.f32.mrf.mxu1 }
 0x4a2   : > { %v4354_v62 = vpop.f32.mrf.mxu0 }
 0x4a4   : > { %v4355_v41 = vpop.f32.mrf.mxu0 }
 0x4a5   : > { %v4356_v21 = vadd.f32 %v4355_v41, %v4354_v62 }
 0x4a6   : > { %v4357_v43 = vpop.f32.mrf.mxu0 }
 0x4a8   : > { %v4358_v63 = vpop.f32.mrf.mxu0 }
 0x4b2   : > { %v4332_v31 = vpop.f32.mrf.mxu1 }
 0x4b4   : > { %v4333_v33 = vpop.f32.mrf.mxu1 }
 0x4b5   : > { %v4334_v28 = vadd.f32 %v4333_v33, %v4332_v31 }
 0x4b6   : > { %v4335_v0 = vpop.f32.mrf.mxu1 }
 0x4b7   : > { %v3437_v8 = vadd.f32 %v4334_v28, %v4312_v30 }
 0x4b8   : > { %v4336_v18 = vpop.f32.mrf.mxu1 }
 0x4b9   : > { %v3477_v12 = vadd.f32 %v4356_v21, %v3437_v8 }
 0x4c3   : > { %v4398_v46 = vpop.f32.mrf.mxu0 }
 0x4c5   : > { %v4399_v51 = vpop.f32.mrf.mxu0 }
 0x4c6   : > { %v4400_v1 = vadd.f32 %v4399_v51, %v4398_v46 }
 0x4c7   : > { %v4401_v52 = vpop.f32.mrf.mxu0 }
 0x4c9   : > { %v4402_v6 = vpop.f32.mrf.mxu0 }
 0x4d2   : > { %v4376_v19 = vpop.f32.mrf.mxu1 }
 0x4d4   : > { %v4377_v10 = vpop.f32.mrf.mxu1 }
 0x4d5   : > { %v4378_v44 = vadd.f32 %v4377_v10, %v4376_v19 }
 0x4d6   : > { %v4379_v47 = vpop.f32.mrf.mxu1 }
 0x4d7   : > { %v3517_v2 = vadd.f32 %v4378_v44, %v3477_v12 }
 0x4d8   : > { %v4380_v35 = vpop.f32.mrf.mxu1 }
 0x4d9   : > { %v3557_v3 = vadd.f32 %v4400_v1, %v3517_v2 }
 0x4db   : > { %3562 = vst [vmem:[%s289_s19] sm:$0xff] %v3557_v3 }
 0x4dc   : > { %4878 = shalt.err (!%p4875_p0)
}
 0x4dd   : > { %s4879_s20 = scalar_lea.hbm %s3575_s10, 128  ;;  %s4883_s16 = scalar_lea.hbm %s5559_s6, 256 }
 0x4de   : > { %p4880_p6 = scmp.ne.s32.totalorder %s3575_s10, %s4879_s20  ;;  %p4884_p5 = scmp.lt.s32.totalorder %s3575_s10, %s5559_s6 }
 0x4df   : > { %p4885_p1 = scmp.lt.s32.totalorder %s4883_s16, %s4879_s20 }
 0x4e0   : > { %p4881_p9 = pnand %p4880_p6, %p5582_p12 }
 0x4e1   : > { %p4886_p3 = por %p4885_p1, %p4884_p5 }
 0x4e2   : > { %p4882_p13 = pneg %p4881_p9 }
 0x4e4   : > { %p4887_p10 = pnand %p4886_p3, %p4882_p13 }
 0x4e6   : > { %4890 = shalt.err (!%p4887_p10)
}
 0x4e7   : > { %4450 = dma.vmem_to_hbm [thread:$0]  (%p5582_p12), %s3578_s26, 128, %s3575_s10, %s3564_s11  }
 0x4e8 PF: > { %p4472_p2 = scmp.ge.s32.totalorder %s4933_s24, 2  ;;  %s3589_s19 = sand.u32 1, %s4921_s21  }
 0x4e9   : > { %p5583_p4 = scmp.ne.s32.totalorder %s5564_s8, 0  ;;  %s3590_s28 = scalar_lea.sflag [#allocation8], %s3589_s19 }
 0x4eb   : > { %p4463_p7 = pnand %p4472_p2, %p5583_p4 }
 0x4ed   : > { %p4464_p8 = pneg %p4463_p7 }
 0x4ef   : > { %4916 = dma.done.wait (%p4464_p8), %s3590_s28, 128  }
 0x4f0   : > { %4918 = vsyncadd (%p4464_p8), %s3590_s28, 4294967168  ;;  %p18_p11 = scmp.ge.s32.totalorder %s5005_s27, 4   ;;  %s5584_s21 = smov %s4925_s22 }
 0x4f1   : > { %s5585_s22 = smov %s4929_s23  ;;  %s5586_s23 = smov %s5016_s30 }
 0x4f2   : > { %s5587_s24 = smov %s5005_s27  ;;  %20 = sbr.rel (!%p18_p11) target bundleno = 5 (0x5), region = 98 }
 0x4f7   :  { %3595 = vsyncpa [#allocation7], 1 }
 0x4f8   :  { %3597 = vsyncpa [#allocation7 + $0x1], 1 }
 0x4f9   :  { %3598 = vsyncpa [#allocation10], 1 }
 0x4fa   :  { %3599 = vsyncpa [#allocation8], 1 }
 0x4fb   :  { %3601 = vsyncpa [#allocation8 + $0x1], 1 }

</bundles_post_ra>
